<compile_context>
chip_gen: v7x
topology: tpu7x:2x2x1
jax: 0.10.0
libtpu: 0.0.40
codegen_flags: <defaults>
</compile_context>

<pallas_src>
import jax
import jax.numpy as jnp
from jax import lax
from jax.experimental import pallas as pl
from jax.experimental.pallas import tpu as pltpu

IN_FEATURES = 28 * 28   # 784
OUT_FEATURES = 28 * 28  # 784
TM_MAX = 512            # batch tile (rows); fits comfortably in VMEM in bf16/f32


def _linear_kernel(x_ref, w_ref, b_ref, o_ref):
    # x_ref: (TM, 784) bf16 | w_ref: (784, 784) bf16, native (out, in) layout
    # b_ref: (1, 784) f32   | o_ref: (TM, 784) f32
    acc = lax.dot_general(
        x_ref[...], w_ref[...],
        dimension_numbers=(((1,), (1,)), ((), ())),   # x @ W^T without transposing W
        preferred_element_type=jnp.float32,
    )
    o_ref[...] = (acc + b_ref[...]).astype(o_ref.dtype)


def dummy_forward(x_pair, weight, bias):
    """Replicates Dummy.forward.

    x_pair: (id_txt, img) tuple; only img (shape (B, 28, 28)) is used.
    weight: (784, 784) as in nn.Linear (out_features, in_features)
    bias:   (784,)
    Returns: (B, 28, 28) float32
    """
    img = x_pair[1]
    B = img.shape[0]

    # bf16 operands, f32 accumulation inside the kernel.
    x2d = img.reshape((-1, IN_FEATURES)).astype(jnp.bfloat16)
    w = weight.astype(jnp.bfloat16)                      # (out, in) — NOT transposed
    b2d = bias.reshape((1, OUT_FEATURES)).astype(jnp.float32)

    # Batch tiling: single block for small B, TM_MAX-row tiles otherwise.
    if B <= TM_MAX:
        tm, bp = B, B
    else:
        tm = TM_MAX
        bp = pl.cdiv(B, tm) * tm
        if bp != B:
            x2d = jnp.pad(x2d, ((0, bp - B), (0, 0)))
    grid = (bp // tm,)

    cost = pl.CostEstimate(
        flops=2 * bp * IN_FEATURES * OUT_FEATURES,
        transcendentals=0,
        bytes_accessed=(bp * IN_FEATURES * 2                 # x (bf16)
                        + OUT_FEATURES * IN_FEATURES * 2     # W (bf16)
                        + OUT_FEATURES * 4                   # bias (f32)
                        + bp * OUT_FEATURES * 4),            # out (f32)
    )

    out2d = pl.pallas_call(
        _linear_kernel,
        out_shape=jax.ShapeDtypeStruct((bp, OUT_FEATURES), jnp.float32),
        grid_spec=pl.GridSpec(
            grid=grid,
            in_specs=[
                pl.BlockSpec((tm, IN_FEATURES), lambda i: (i, 0)),
                # weight / bias: same block every step -> stay resident in VMEM
                pl.BlockSpec((OUT_FEATURES, IN_FEATURES), lambda i: (0, 0)),
                pl.BlockSpec((1, OUT_FEATURES), lambda i: (0, 0)),
            ],
            out_specs=pl.BlockSpec((tm, OUT_FEATURES), lambda i: (i, 0)),
        ),
        compiler_params=pltpu.CompilerParams(
            dimension_semantics=("parallel",),
        ),
        cost_estimate=cost,
    )(x2d, w, b2d)

    if bp != B:
        out2d = out2d[:B]
    return out2d.reshape((-1, 28, 28))


if __name__ == "__main__":
    key = jax.random.PRNGKey(0)
    k_w, k_b, k_img, k_id = jax.random.split(key, 4)

    # Deterministic parameter init (shapes from nn.Linear(784, 784)).
    bound = 1.0 / (IN_FEATURES ** 0.5)
    weight = jax.random.uniform(k_w, (OUT_FEATURES, IN_FEATURES),
                                minval=-bound, maxval=bound, dtype=jnp.float32)
    bias = jax.random.uniform(k_b, (OUT_FEATURES,),
                              minval=-bound, maxval=bound, dtype=jnp.float32)

    # Small example input consistent with the module: a pair (id, img).
    B = 2
    img = jax.random.normal(k_img, (B, 28, 28), dtype=jnp.float32)
    ids = jax.random.randint(k_id, (B,), 0, 10)   # stands in for the 'txt' id field
    x_pair = (ids, img)

    out = dummy_forward(x_pair, weight, bias)
    out = jax.block_until_ready(out)
    assert out.shape == (B, 28, 28)

    # Same-precision reference (bf16 operands, f32 accumulation) — tight check.
    x_bf16 = img.reshape(-1, IN_FEATURES).astype(jnp.bfloat16)
    ref_bf16 = (jnp.dot(x_bf16, weight.astype(jnp.bfloat16).T,
                        preferred_element_type=jnp.float32)
                + bias).reshape(-1, 28, 28)
    assert jnp.allclose(out, ref_bf16, atol=1e-2, rtol=1e-2)

    # Full-f32 PyTorch-equivalent reference — loose check (bf16 operand rounding).
    ref_f32 = (img.reshape(-1, IN_FEATURES) @ weight.T + bias).reshape(-1, 28, 28)
    assert jnp.allclose(out, ref_f32, atol=5e-2, rtol=5e-2)

    print("KERNEL_OK")
</pallas_src>

<mosaic_0001>
module attributes {stable_mosaic.version = 11 : i64} {
  func.func @_linear_kernel(%arg0: i32, %arg1: memref<2x784xbf16, #tpu.memory_space<vmem>>, %arg2: memref<784x784xbf16, #tpu.memory_space<vmem>>, %arg3: memref<1x784xf32, #tpu.memory_space<vmem>>, %arg4: memref<2x784xf32, #tpu.memory_space<vmem>>) attributes {dimension_semantics = [#tpu.dimension_semantics<parallel>], iteration_bounds = array<i64: 1>, scalar_prefetch = 0 : i64, scratch_operands = 0 : i64, tpu.core_type = #tpu.core_type<tc>, window_params = [{transform_indices = @transform_0, window_bounds = array<i64: 2, 784>}, {pipeline_mode = #tpu.pipeline_mode<synchronous>, transform_indices = @transform_1, window_bounds = array<i64: 784, 784>}, {pipeline_mode = #tpu.pipeline_mode<synchronous>, transform_indices = @transform_2, window_bounds = array<i64: 1, 784>}, {transform_indices = @transform_3, window_bounds = array<i64: 2, 784>}]} {
    %c0 = arith.constant 0 : index
    %c0_0 = arith.constant 0 : index
    %0 = vector.load %arg1[%c0, %c0_0] : memref<2x784xbf16, #tpu.memory_space<vmem>>, vector<2x784xbf16>
    %c0_1 = arith.constant 0 : index
    %c0_2 = arith.constant 0 : index
    %1 = vector.load %arg2[%c0_1, %c0_2] : memref<784x784xbf16, #tpu.memory_space<vmem>>, vector<784x784xbf16>
    %cst = arith.constant dense<0.000000e+00> : vector<2x784xf32>
    %2 = tpu.matmul %0, %1, %cst {dimension_numbers = #tpu.dot_dimension_numbers<[1], [1], [0], [0], [0, 0, 1, 0], [], []>} : vector<2x784xbf16>, vector<784x784xbf16>, vector<2x784xf32> -> vector<2x784xf32>
    %c0_3 = arith.constant 0 : index
    %c0_4 = arith.constant 0 : index
    %3 = vector.load %arg3[%c0_3, %c0_4] : memref<1x784xf32, #tpu.memory_space<vmem>>, vector<1x784xf32>
    %4 = vector.broadcast %3 : vector<1x784xf32> to vector<2x784xf32>
    %5 = arith.addf %2, %4 : vector<2x784xf32>
    %c0_5 = arith.constant 0 : index
    %c0_6 = arith.constant 0 : index
    %6 = vector.load %arg4[%c0_5, %c0_6] : memref<2x784xf32, #tpu.memory_space<vmem>>, vector<2x784xf32>
    tpu.vector_store %arg4[%c0_5, %c0_6], %5 {strides = array<i32>} : memref<2x784xf32, #tpu.memory_space<vmem>>, vector<2x784xf32>,
    return
  }
  func.func @transform_0(%arg0: i32) -> (i32, i32) {
    %c0_i32 = arith.constant 0 : i32
    %c0_i32_0 = arith.constant 0 : i32
    return %arg0, %c0_i32 : i32, i32
  }
  func.func @transform_1(%arg0: i32) -> (i32, i32) {
    %c0_i32 = arith.constant 0 : i32
    %c0_i32_0 = arith.constant 0 : i32
    %c0_i32_1 = arith.constant 0 : i32
    return %c0_i32, %c0_i32_0 : i32, i32
  }
  func.func @transform_2(%arg0: i32) -> (i32, i32) {
    %c0_i32 = arith.constant 0 : i32
    %c0_i32_0 = arith.constant 0 : i32
    %c0_i32_1 = arith.constant 0 : i32
    return %c0_i32, %c0_i32_0 : i32, i32
  }
  func.func @transform_3(%arg0: i32) -> (i32, i32) {
    %c0_i32 = arith.constant 0 : i32
    %c0_i32_0 = arith.constant 0 : i32
    return %arg0, %c0_i32 : i32, i32
  }
}

</mosaic_0001>

<bundles_post_ra>
// kernel: tpu_custom_call.1
= control target key start
LH: loop header
LB: loop body
LE: loop exit
PB: predicated region body
PF: predicated region fallthrough
CT: control target
= control target key end

     0   :  { %8 = vsyncpa [#allocation3], 0  ;;  %s4444_s0 = inlined_call_operand.hbm [shape: bf16[2,784], index: 0, kind: input, shape index: {}]   ;;  %s4445_s1 = inlined_call_operand.hbm [shape: bf16[784,784], index: 1, kind: input, shape index: {}]   ;;  %s4446_s2 = inlined_call_operand.hbm [shape: f32[1,784], index: 2, kind: input, shape index: {}]   ;;  %s4447_s3 = inlined_call_operand.hbm [shape: f32[2,784], index: 3, kind: output, shape index: {}]  }
   0x1   :  { %9 = vsyncpa [#allocation6], 0 }
   0x2   :  { %10 = vsyncpa [#allocation4], 0  ;;  %s4200_s12 = smov [#allocation5]   ;;  %s4106_s16 = scalar_lea.hbm %s4445_s1, 43904 }
   0x3   :  { %s26_s13 = sshll.u32 %s4200_s12, 4  ;;  %p4107_p0 = scmp.ne.s32.totalorder %s4445_s1, %s4106_s16  ;;  %s27_s13 = int_to_ptr.vmem [resolvable:$true] %s26_s13 }
   0x4   :  { %p4110_p1 = scmp.lt.u32.totalorder %s4106_s16, %s4445_s1 }
   0x6   :  { %p4112_p2 = pnand %p4110_p1, %p4107_p0 }
   0x8   :  { %4115 = shalt.err (!%p4112_p2)
}
   0x9   :  { %s4116_s21 = scalar_lea.vmem %s27_s13, 43904  ;;  %p4121_p4 = scmp.lt.s32.totalorder %s27_s13, %s27_s13 }
   0xa   :  { %p4117_p3 = scmp.ne.s32.totalorder %s27_s13, %s4116_s21  ;;  %p4122_p5 = scmp.lt.s32.totalorder %s4116_s21, %s4116_s21 }
   0xc   :  { %p4123_p6 = por %p4122_p5, %p4121_p4 }
   0xe   :  { %p4124_p7 = pnand %p4123_p6, %p4117_p3 }
  0x10   :  { %4127 = shalt.err (!%p4124_p7)
}
  0x11   :  { %s4201_s22 = smov 448   ;;  %s4202_s23 = smov 28  }
  0x12   :  { %32 = dma.hbm_to_vmem [thread:$0]  %s4445_s1, 43904, %s27_s13, [#allocation6], %s4201_s22, %s4201_s22, %s4202_s23  }
  0x13   :  { %s4203_s26 = smov [#allocation2]   ;;  %s4204_s28 = smov [#allocation7]  }
  0x14   :  { %s17_s27 = sshll.u32 %s4203_s26, 4  ;;  %s39_s29 = sshll.u32 %s4204_s28, 4  ;;  %s18_s27 = int_to_ptr.vmem [resolvable:$true] %s17_s27  ;;  %s40_s29 = int_to_ptr.vmem [resolvable:$true] %s39_s29 }
  0x15   :  { %s4128_s5 = scalar_lea.hbm %s4444_s0, 112 }
  0x16   :  { %p4129_p8 = scmp.ne.s32.totalorder %s4444_s0, %s4128_s5  ;;  %p4132_p9 = scmp.lt.u32.totalorder %s4128_s5, %s4444_s0 }
  0x18   :  { %p4134_p10 = pnand %p4132_p9, %p4129_p8 }
  0x1a   :  { %4137 = shalt.err (!%p4134_p10)
}
  0x1b   :  { %s4138_s1 = scalar_lea.vmem %s18_s27, 112  ;;  %s4142_s10 = scalar_lea.vmem %s18_s27, 128 }
  0x1c   :  { %p4139_p11 = scmp.ne.s32.totalorder %s18_s27, %s4138_s1  ;;  %p4143_p12 = scmp.lt.s32.totalorder %s18_s27, %s18_s27 }
  0x1d   :  { %p4144_p13 = scmp.lt.s32.totalorder %s4142_s10, %s4138_s1 }
  0x1f   :  { %p4145_p0 = por %p4144_p13, %p4143_p12 }
  0x21   :  { %p4146_p1 = pnand %p4145_p0, %p4139_p11 }
  0x23   :  { %4149 = shalt.err (!%p4146_p1)
}
  0x24   :  { %20 = dma.hbm_to_vmem [thread:$0]  %s4444_s0, 112, %s18_s27, [#allocation3]  }
  0x25   :  { %s4150_s15 = scalar_lea.hbm %s4446_s2, 112 }
  0x26   :  { %p4151_p2 = scmp.ne.s32.totalorder %s4446_s2, %s4150_s15  ;;  %p4154_p3 = scmp.lt.u32.totalorder %s4150_s15, %s4446_s2 }
  0x28   :  { %p4156_p4 = pnand %p4154_p3, %p4151_p2 }
  0x2a   :  { %4159 = shalt.err (!%p4156_p4)
}
  0x2b   :  { %s4160_s20 = scalar_lea.vmem %s40_s29, 112  ;;  %s4164_s21 = scalar_lea.vmem %s40_s29, 128 }
  0x2c   :  { %p4161_p5 = scmp.ne.s32.totalorder %s40_s29, %s4160_s20  ;;  %p4165_p6 = scmp.lt.s32.totalorder %s40_s29, %s40_s29 }
  0x2d   :  { %p4166_p7 = scmp.lt.s32.totalorder %s4164_s21, %s4160_s20 }
  0x2f   :  { %p4167_p8 = por %p4166_p7, %p4165_p6 }
  0x31   :  { %p4168_p9 = pnand %p4167_p8, %p4161_p5 }
  0x33   :  { %4171 = shalt.err (!%p4168_p9)
}
  0x34   :  { %42 = dma.hbm_to_vmem [thread:$0]  %s4446_s2, 112, %s40_s29, [#allocation6]  }
  0x35   :  { %4194 = dma.done.wait [#allocation3], 112  }
  0x36   :  { %4195 = vsyncadd [#allocation3], 4294967184 }
  0x37   :  { %4196 = dma.done.wait [#allocation6], 44016  }
  0x38   :  { %4197 = vsyncadd [#allocation6], 4294923280  ;;  %v3615_v0 = vld [vmem:[#allocation5 + $0x4] ss:$28 sps:$4 sm:$0xff]   ;;  %v3617_v1 = vld [vmem:[#allocation5 + $0xc] ss:$28 sps:$4 sm:$0xff]   ;;  %v448_v20 = vlaneseq }
  0x39   :  { %2404 = vmatprep.subr.bf16.mxu1 %v3615_v0  ;;  %v3619_v2 = vld [vmem:[#allocation5] ss:$28 sps:$4 sm:$0xff]   ;;  %v3620_v3 = vld [vmem:[#allocation5 + $0x8] ss:$28 sps:$4 sm:$0xff]   ;;  %2445 = vmatprep.subr.bf16.mxu0 %v3617_v1  ;;  %v3625_v6 = vld [vmem:[#allocation5 + $0x38] ss:$28 sps:$4 sm:$0xff]  }
  0x3a   :  { %v3621_v4 = vld [vmem:[#allocation5 + $0x3c] ss:$28 sps:$4 sm:$0xff]   ;;  %2405 = vmatpush1.bf16.xpose.msra.mxu1 %v3619_v2  ;;  %2446 = vmatpush1.bf16.xpose.msra.mxu0 %v3620_v3  ;;  %v3623_v5 = vld [vmem:[#allocation5 + $0x44] ss:$28 sps:$4 sm:$0xff]   ;;  %v3627_v8 = vld [vmem:[#allocation5 + $0x74] ss:$28 sps:$4 sm:$0xff]  }
  0x3b   :  { %2406 = vmatprep.subr.bf16.mxu1 %v3621_v4  ;;  %2447 = vmatprep.subr.bf16.mxu0 %v3623_v5  ;;  %v3626_v7 = vld [vmem:[#allocation5 + $0x40] ss:$28 sps:$4 sm:$0xff]   ;;  %v3631_v10 = vld [vmem:[#allocation5 + $0x70] ss:$28 sps:$4 sm:$0xff]   ;;  %v3632_v11 = vld [vmem:[#allocation5 + $0x78] ss:$28 sps:$4 sm:$0xff]  }
  0x3c   :  { %v3629_v9 = vld [vmem:[#allocation5 + $0x7c] ss:$28 sps:$4 sm:$0xff]   ;;  %v3633_v12 = vld [vmem:[#allocation5 + $0xac] ss:$28 sps:$4 sm:$0xff]   ;;  %v3635_v13 = vld [vmem:[#allocation5 + $0xb4] ss:$28 sps:$4 sm:$0xff]  }
  0x3d   :  { %v3637_v14 = vld [vmem:[#allocation5 + $0xa8] ss:$28 sps:$4 sm:$0xff]   ;;  %v3638_v15 = vld [vmem:[#allocation5 + $0xb0] ss:$28 sps:$4 sm:$0xff]   ;;  %v3643_v18 = vld [vmem:[#allocation5 + $0xe0] ss:$28 sps:$4 sm:$0xff]  }
  0x3e   :  { %v3639_v16 = vld [vmem:[#allocation5 + $0xe4] ss:$28 sps:$4 sm:$0xff]   ;;  %v3641_v17 = vld [vmem:[#allocation5 + $0xec] ss:$28 sps:$4 sm:$0xff]   ;;  %v4205_v21 = vmov 1966171168  }
  0x3f   :  { %v3644_v19 = vld [vmem:[#allocation5 + $0xe8] ss:$28 sps:$4 sm:$0xff]   ;;  %v486_v22 = vunpack.c.l.s4 %v4205_v21  ;;  %v3645_v23 = vld [vmem:[#allocation5 + $0x11c] ss:$28 sps:$4 sm:$0xff]   ;;  %v4266_v25 = vshrl.u32 %v448_v20, 7  ;;  %vm2253_vm0 = vcmask 130048  }
  0x40   :  { %v3647_v24 = vld [vmem:[#allocation5 + $0x124] ss:$28 sps:$4 sm:$0xff]   ;;  %v3649_v27 = vld [vmem:[#allocation5 + $0x118] ss:$28 sps:$4 sm:$0xff]   ;;  %v3655_v35 = vld [vmem:[#allocation5 + $0x150] ss:$28 sps:$4 sm:$0xff]  }
  0x41   :  { %v487_v26 = vunpack.c.0.s8 %v486_v22  ;;  %v3650_v28 = vld [vmem:[#allocation5 + $0x120] ss:$28 sps:$4 sm:$0xff]   ;;  %v3651_v30 = vld [vmem:[#allocation5 + $0x154] ss:$28 sps:$4 sm:$0xff]   ;;  %v3657_v38 = vld [vmem:[#allocation5 + $0x18c] ss:$28 sps:$4 sm:$0xff]  }
  0x42   :  { %2407 = vmatpush1.bf16.xpose.msra.mxu1 %v3625_v6  ;;  %2448 = vmatpush1.bf16.xpose.msra.mxu0 %v3626_v7  ;;  %v3653_v31 = vld [vmem:[#allocation5 + $0x15c] ss:$28 sps:$4 sm:$0xff]   ;;  %v3659_v39 = vld [vmem:[#allocation5 + $0x194] ss:$28 sps:$4 sm:$0xff]   ;;  %v3661_v41 = vld [vmem:[#allocation5 + $0x188] ss:$28 sps:$4 sm:$0xff]  }
  0x43   :  { %2408 = vmatprep.subr.bf16.mxu1 %v3627_v8  ;;  %2449 = vmatprep.subr.bf16.mxu0 %v3629_v9  ;;  %v4269_v29 = vsub.s32 %v487_v26, %v4266_v25  ;;  %v4271_v32 = vld [vmem:[#allocation2] sm:$0x7f]  ;;  %v3662_v42 = vld [vmem:[#allocation5 + $0x190] ss:$28 sps:$4 sm:$0xff]   ;;  %v3663_v43 = vld [vmem:[#allocation5 + $0x1c4] ss:$28 sps:$4 sm:$0xff]  }
  0x44   :  { %v3656_v36 = vld [vmem:[#allocation5 + $0x158] ss:$28 sps:$4 sm:$0xff]   ;;  %v3665_v44 = vld [vmem:[#allocation5 + $0x1cc] ss:$28 sps:$4 sm:$0xff]   ;;  %v3667_v45 = vld [vmem:[#allocation5 + $0x1c0] ss:$28 sps:$4 sm:$0xff]  }
  0x45   :  { %v4275_v33 = vrot.slane %v4271_v32, %v4269_v29  ;;  %v3668_v46 = vld [vmem:[#allocation5 + $0x1c8] ss:$28 sps:$4 sm:$0xff]   ;;  %v3669_v47 = vld [vmem:[#allocation5 + $0x1fc] ss:$28 sps:$4 sm:$0xff]   ;;  %v3675_v51 = vld [vmem:[#allocation5 + $0x234] ss:$28 sps:$4 sm:$0xff]  }
  0x46   :  { %v3671_v48 = vld [vmem:[#allocation5 + $0x204] ss:$28 sps:$4 sm:$0xff]   ;;  %v3673_v49 = vld [vmem:[#allocation5 + $0x1f8] ss:$28 sps:$4 sm:$0xff]   ;;  %v3679_v53 = vld [vmem:[#allocation5 + $0x230] ss:$28 sps:$4 sm:$0xff]  }
  0x47   :  { %v499_v34 = vcombine.high %v4275_v33, %v4275_v33  ;;  %v3674_v50 = vld [vmem:[#allocation5 + $0x200] ss:$28 sps:$4 sm:$0xff]   ;;  %v3680_v54 = vld [vmem:[#allocation5 + $0x238] ss:$28 sps:$4 sm:$0xff]   ;;  %v3681_v55 = vld [vmem:[#allocation5 + $0x26c] ss:$28 sps:$4 sm:$0xff]  }
  0x48   :  { %v3677_v52 = vld [vmem:[#allocation5 + $0x23c] ss:$28 sps:$4 sm:$0xff]   ;;  %v3683_v56 = vld [vmem:[#allocation5 + $0x274] ss:$28 sps:$4 sm:$0xff]   ;;  %v3685_v57 = vld [vmem:[#allocation5 + $0x268] ss:$28 sps:$4 sm:$0xff]  }
  0x49   :  { %v4280_v37 = vrot.slane %v499_v34, %v4269_v29  ;;  %v3686_v58 = vld [vmem:[#allocation5 + $0x270] ss:$28 sps:$4 sm:$0xff]   ;;  %v3687_v59 = vld [vmem:[#allocation5 + $0x2a4] ss:$28 sps:$4 sm:$0xff]   ;;  %v3693_v63 = vld [vmem:[#allocation5 + $0x2dc] ss:$28 sps:$4 sm:$0xff]  }
  0x4a   :  { %2409 = vmatpush1.bf16.xpose.msra.mxu1 %v3631_v10  ;;  %2450 = vmatpush1.bf16.xpose.msra.mxu0 %v3632_v11  ;;  %v3689_v60 = vld [vmem:[#allocation5 + $0x2ac] ss:$28 sps:$4 sm:$0xff]   ;;  %v3691_v61 = vld [vmem:[#allocation5 + $0x2a0] ss:$28 sps:$4 sm:$0xff]   ;;  %v3697_v1 = vld [vmem:[#allocation5 + $0x2d8] ss:$28 sps:$4 sm:$0xff]   ;;  %v484_v11 = vcombine.high %v4271_v32, %v4271_v32 }
  0x4b   :  { %2410 = vmatprep.subr.bf16.mxu1 %v3633_v12  ;;  %2451 = vmatprep.subr.bf16.mxu0 %v3635_v13  ;;  %v4285_v40 = vcombine.high %v4280_v37, %v4280_v37  ;;  %v3692_v62 = vld [vmem:[#allocation5 + $0x2a8] ss:$28 sps:$4 sm:$0xff]   ;;  %v3698_v2 = vld [vmem:[#allocation5 + $0x2e0] ss:$28 sps:$4 sm:$0xff]   ;;  %v3699_v3 = vld [vmem:[#allocation5 + $0x314] ss:$28 sps:$4 sm:$0xff]  }
  0x4c   :  { %2436 = vmatprep.mubr.bf16.mxu1 %v4280_v37  ;;  %v3695_v0 = vld [vmem:[#allocation5 + $0x2e4] ss:$28 sps:$4 sm:$0xff]   ;;  %v3701_v4 = vld [vmem:[#allocation5 + $0x31c] ss:$28 sps:$4 sm:$0xff]   ;;  %v3703_v5 = vld [vmem:[#allocation5 + $0x310] ss:$28 sps:$4 sm:$0xff]  }
  0x4d   :  { %2477 = vmatprep.mubr.bf16.mxu0 %v4285_v40  ;;  %v3704_v6 = vld [vmem:[#allocation5 + $0x318] ss:$28 sps:$4 sm:$0xff]   ;;  %v3705_v7 = vld [vmem:[#allocation5 + $0x34c] ss:$28 sps:$4 sm:$0xff]   ;;  %vm4207_vm1 = vmmov 0   ;;  %vm3099_vm2 = vcmask 1041408  }
  0x4e   :  { %v3707_v8 = vld [vmem:[#allocation5 + $0x354] ss:$28 sps:$4 sm:$0xff]   ;;  %v3709_v9 = vld [vmem:[#allocation5 + $0x348] ss:$28 sps:$4 sm:$0xff]   ;;  %v3729_v34 = vld [vmem:[#allocation5 + $0xbc] ss:$28 sps:$4 sm:$0xff]  }
  0x4f   :  { %v3710_v10 = vld [vmem:[#allocation5 + $0x350] ss:$28 sps:$4 sm:$0xff]   ;;  %v3715_v13 = vld [vmem:[#allocation5 + $0x1d8] ss:$28 sps:$4 sm:$0xff]   ;;  %v3726_v32 = vld [vmem:[#allocation5 + $0x88] ss:$28 sps:$4 sm:$0xff]  }
  0x50   :  { %v3714_v12 = vld [vmem:[#allocation5 + $0x14] ss:$28 sps:$4 sm:$0xff]   ;;  %v3719_v22 = vld [vmem:[#allocation5 + $0x4c] ss:$28 sps:$4 sm:$0xff]   ;;  %vm3100_vm3 = vcmask 1043458   ;;  %vm3102_vm5 = vcmask 128004  }
  0x51   :  { %vm3101_vm4 = vmor %vm3100_vm3, %vm3099_vm2  ;;  %s4209_s2 = smov [#allocation8]  }
  0x52   :  { %2411 = vmatpush1.bf16.xpose.msra.mxu1 %v3637_v14  ;;  %2452 = vmatpush1.bf16.xpose.msra.mxu0 %v3638_v15  ;;  %v498_v14 = vrot.slane %v484_v11, %v4269_v29  ;;  %v4293_v15 = vrot.slane %v4275_v33, %v4269_v29  ;;  %v3722_v33 = vld [vmem:[#allocation5 + $0x80] ss:$28 sps:$4 sm:$0xff]   ;;  %v3775_v11 = vld [vmem:[#allocation5 + $0x42c] ss:$28 sps:$4 sm:$0xff]   ;;  %s3111_s23 = sshll.u32 %s4209_s2, 4  ;;  %vm3103_vm6 = vmor %vm3102_vm5, %vm3101_vm4  ;;  %s3112_s23 = int_to_ptr.vmem [resolvable:$true] %s3111_s23 }
  0x53   :  { %2412 = vmatprep.subr.bf16.mxu1 %v3639_v16  ;;  %2453 = vmatprep.subr.bf16.mxu0 %v3641_v17  ;;  %v3716_v16 = vld [vmem:[#allocation5 + $0x18] ss:$28 sps:$4 sm:$0xff]   ;;  %s4172_s24 = scalar_lea.vmem %s3112_s23, 224  ;;  %p4177_p11 = scmp.lt.s32.totalorder %s3112_s23, %s3112_s23 }
  0x54   :  { %v4297_v17 = vrot.slane %v498_v14, %v4269_v29  ;;  %v4301_v20 = vcombine.high %v4293_v15, %v4293_v15  ;;  %v2258_v21 = vsel %vm2253_vm0, %v3716_v16, 0  ;;  %v3781_v16 = vld [vmem:[#allocation5 + $0x464] ss:$28 sps:$4 sm:$0xff]   ;;  %p4173_p10 = scmp.ne.s32.totalorder %s3112_s23, %s4172_s24  ;;  %p4178_p12 = scmp.lt.s32.totalorder %s4172_s24, %s4172_s24 }
  0x56   :  { %p4179_p13 = por %p4178_p12, %p4177_p11 }
  0x58   :  { %p4180_p0 = pnand %p4179_p13, %p4173_p10 }
  0x5a   :  { %2413 = vmatpush1.bf16.xpose.msra.mxu1 %v3643_v18  ;;  %2454 = vmatpush1.bf16.xpose.msra.mxu0 %v3644_v19  ;;  %v3712_v18 = vld [vmem:[#allocation5 + $0x10] ss:$28 sps:$4 sm:$0xff]   ;;  %v500_v19 = vcombine.high %v498_v14, %v498_v14 }
  0x5b   :  { %2414 = vmatprep.subr.bf16.mxu1 %v3645_v23  ;;  %2455 = vmatprep.subr.bf16.mxu0 %v3647_v24  ;;  %v3720_v23 = vld [vmem:[#allocation5 + $0x210] ss:$28 sps:$4 sm:$0xff]   ;;  %v4306_v24 = vcombine.high %v4297_v17, %v4297_v17 }
  0x5c   :  { %v4309_v26 = vrot.slane %v500_v19, %v4269_v29  ;;  %v3778_v14 = vld [vmem:[#allocation5 + $0x2b4] ss:$28 sps:$4 sm:$0xff]   ;;  %v3779_v19 = vld [vmem:[#allocation5 + $0x460] ss:$28 sps:$4 sm:$0xff]  }
  0x62   :  { %2415 = vmatpush1.bf16.xpose.msra.mxu1 %v3649_v27  ;;  %2456 = vmatpush1.bf16.xpose.msra.mxu0 %v3650_v28  ;;  %v3721_v27 = vld [vmem:[#allocation5 + $0x50] ss:$28 sps:$4 sm:$0xff]   ;;  %v3717_v28 = vld [vmem:[#allocation5 + $0x48] ss:$28 sps:$4 sm:$0xff]  }
  0x63   :  { %2416 = vmatprep.subr.bf16.mxu1 %v3651_v30  ;;  %2457 = vmatprep.subr.bf16.mxu0 %v3653_v31  ;;  %v3724_v30 = vld [vmem:[#allocation5 + $0x84] ss:$28 sps:$4 sm:$0xff]   ;;  %v2261_v29 = vsel %vm2253_vm0, %v3721_v27, 0  ;;  %v3785_v27 = vld [vmem:[#allocation5 + $0x498] ss:$28 sps:$4 sm:$0xff]  }
  0x64   :  { %v3725_v31 = vld [vmem:[#allocation5 + $0x248] ss:$28 sps:$4 sm:$0xff]  }
  0x6a   :  { %2417 = vmatpush1.bf16.xpose.msra.mxu1 %v3655_v35  ;;  %2458 = vmatpush1.bf16.xpose.msra.mxu0 %v3656_v36  ;;  %v3730_v35 = vld [vmem:[#allocation5 + $0x280] ss:$28 sps:$4 sm:$0xff]   ;;  %v2264_v36 = vsel %vm2253_vm0, %v3726_v32, 0 }
  0x6b   :  { %2418 = vmatprep.subr.bf16.mxu1 %v3657_v38  ;;  %2459 = vmatprep.subr.bf16.mxu0 %v3659_v39  ;;  %v3731_v38 = vld [vmem:[#allocation5 + $0xc0] ss:$28 sps:$4 sm:$0xff]   ;;  %v3727_v39 = vld [vmem:[#allocation5 + $0xb8] ss:$28 sps:$4 sm:$0xff]  }
  0x6c   :  { %v3796_v32 = vld [vmem:[#allocation5 + $0x35c] ss:$28 sps:$4 sm:$0xff]  }
  0x72   :  { %2419 = vmatpush1.bf16.xpose.msra.mxu1 %v3661_v41  ;;  %2460 = vmatpush1.bf16.xpose.msra.mxu0 %v3662_v42  ;;  %v3734_v41 = vld [vmem:[#allocation5 + $0xf4] ss:$28 sps:$4 sm:$0xff]  }
  0x73   :  { %2420 = vmatprep.subr.bf16.mxu1 %v3663_v43  ;;  %2461 = vmatprep.subr.bf16.mxu0 %v3665_v44  ;;  %v3735_v42 = vld [vmem:[#allocation5 + $0x2b8] ss:$28 sps:$4 sm:$0xff]   ;;  %v2267_v43 = vsel %vm2253_vm0, %v3731_v38, 0  ;;  %v3805_v38 = vld [vmem:[#allocation5 + $0x704] ss:$28 sps:$4 sm:$0xff]  }
  0x74   :  { %v3736_v44 = vld [vmem:[#allocation5 + $0xf8] ss:$28 sps:$4 sm:$0xff]  }
  0x7a   :  { %2421 = vmatpush1.bf16.xpose.msra.mxu1 %v3667_v45  ;;  %2462 = vmatpush1.bf16.xpose.msra.mxu0 %v3668_v46  ;;  %v3732_v45 = vld [vmem:[#allocation5 + $0xf0] ss:$28 sps:$4 sm:$0xff]  }
  0x7b   :  { %2422 = vmatprep.subr.bf16.mxu1 %v3669_v47  ;;  %2463 = vmatprep.subr.bf16.mxu0 %v3671_v48  ;;  %v3739_v46 = vld [vmem:[#allocation5 + $0x12c] ss:$28 sps:$4 sm:$0xff]   ;;  %v2270_v48 = vsel %vm2253_vm0, %v3736_v44, 0  ;;  %v3806_v44 = vld [vmem:[#allocation5 + $0x578] ss:$28 sps:$4 sm:$0xff]  }
  0x7c   :  { %v3740_v47 = vld [vmem:[#allocation5 + $0x2f0] ss:$28 sps:$4 sm:$0xff]  }
  0x82   :  { %2423 = vmatpush1.bf16.xpose.msra.mxu1 %v3673_v49  ;;  %2464 = vmatpush1.bf16.xpose.msra.mxu0 %v3674_v50  ;;  %v3741_v49 = vld [vmem:[#allocation5 + $0x130] ss:$28 sps:$4 sm:$0xff]   ;;  %v3737_v50 = vld [vmem:[#allocation5 + $0x128] ss:$28 sps:$4 sm:$0xff]  }
  0x83   :  { %2424 = vmatprep.subr.bf16.mxu1 %v3675_v51  ;;  %2465 = vmatprep.subr.bf16.mxu0 %v3677_v52  ;;  %v3744_v51 = vld [vmem:[#allocation5 + $0x164] ss:$28 sps:$4 sm:$0xff]  }
  0x84   :  { %v3745_v52 = vld [vmem:[#allocation5 + $0x328] ss:$28 sps:$4 sm:$0xff]  }
  0x8a   :  { %2425 = vmatpush1.bf16.xpose.msra.mxu1 %v3679_v53  ;;  %2466 = vmatpush1.bf16.xpose.msra.mxu0 %v3680_v54  ;;  %v2273_v53 = vsel %vm2253_vm0, %v3741_v49, 0  ;;  %v3746_v54 = vld [vmem:[#allocation5 + $0x168] ss:$28 sps:$4 sm:$0xff]   ;;  %v3815_v49 = vld [vmem:[#allocation5 + $0x770] ss:$28 sps:$4 sm:$0xff]  }
  0x8b   :  { %2426 = vmatprep.subr.bf16.mxu1 %v3681_v55  ;;  %2467 = vmatprep.subr.bf16.mxu0 %v3683_v56  ;;  %v3742_v55 = vld [vmem:[#allocation5 + $0x160] ss:$28 sps:$4 sm:$0xff]  }
  0x8c   :  { %v3749_v56 = vld [vmem:[#allocation5 + $0x19c] ss:$28 sps:$4 sm:$0xff]  }
  0x92   :  { %2427 = vmatpush1.bf16.xpose.msra.mxu1 %v3685_v57  ;;  %2468 = vmatpush1.bf16.xpose.msra.mxu0 %v3686_v58  ;;  %v3750_v57 = vld [vmem:[#allocation5 + $0x360] ss:$28 sps:$4 sm:$0xff]   ;;  %v2276_v58 = vsel %vm2253_vm0, %v3746_v54, 0 }
  0x93   :  { %2428 = vmatprep.subr.bf16.mxu1 %v3687_v59  ;;  %2469 = vmatprep.subr.bf16.mxu0 %v3689_v60  ;;  %v3751_v59 = vld [vmem:[#allocation5 + $0x1a0] ss:$28 sps:$4 sm:$0xff]   ;;  %v3747_v60 = vld [vmem:[#allocation5 + $0x198] ss:$28 sps:$4 sm:$0xff]  }
  0x94   :  { %v3826_v54 = vld [vmem:[#allocation5 + $0x624] ss:$28 sps:$4 sm:$0xff]  }
  0x9a   :  { %2429 = vmatpush1.bf16.xpose.msra.mxu1 %v3691_v61  ;;  %2470 = vmatpush1.bf16.xpose.msra.mxu0 %v3692_v62  ;;  %v2279_v61 = vsel %vm2253_vm0, %v3751_v59, 0  ;;  %v3754_v62 = vld [vmem:[#allocation5 + $0x1d4] ss:$28 sps:$4 sm:$0xff]   ;;  %v3835_v59 = vld [vmem:[#allocation5 + $0x81c] ss:$28 sps:$4 sm:$0xff]  }
  0x9b   :  { %2430 = vmatprep.subr.bf16.mxu1 %v3693_v63  ;;  %2471 = vmatprep.subr.bf16.mxu0 %v3695_v0  ;;  %v3757_v63 = vld [vmem:[#allocation5 + $0x384] ss:$28 sps:$4 sm:$0xff]   ;;  %v3752_v0 = vld [vmem:[#allocation5 + $0x1d0] ss:$28 sps:$4 sm:$0xff]  }
  0xa2   :  { %2431 = vmatpush1.bf16.xpose.msra.mxu1 %v3697_v1  ;;  %2472 = vmatpush1.bf16.xpose.msra.mxu0 %v3698_v2  ;;  %v3755_v1 = vld [vmem:[#allocation5 + $0x380] ss:$28 sps:$4 sm:$0xff]   ;;  %v3760_v2 = vld [vmem:[#allocation5 + $0x20c] ss:$28 sps:$4 sm:$0xff]  }
  0xa3   :  { %2432 = vmatprep.subr.bf16.mxu1 %v3699_v3  ;;  %2473 = vmatprep.subr.bf16.mxu0 %v3701_v4  ;;  %v3763_v3 = vld [vmem:[#allocation5 + $0x3bc] ss:$28 sps:$4 sm:$0xff]   ;;  %v3758_v4 = vld [vmem:[#allocation5 + $0x208] ss:$28 sps:$4 sm:$0xff]  }
  0xaa   :  { %2433 = vmatpush1.bf16.xpose.msra.mxu1 %v3703_v5  ;;  %2474 = vmatpush1.bf16.xpose.msra.mxu0 %v3704_v6  ;;  %v3761_v5 = vld [vmem:[#allocation5 + $0x3b8] ss:$28 sps:$4 sm:$0xff]   ;;  %v3766_v6 = vld [vmem:[#allocation5 + $0x244] ss:$28 sps:$4 sm:$0xff]  }
  0xab   :  { %2434 = vmatprep.subr.bf16.mxu1 %v3705_v7  ;;  %2475 = vmatprep.subr.bf16.mxu0 %v3707_v8  ;;  %v3769_v7 = vld [vmem:[#allocation5 + $0x3f4] ss:$28 sps:$4 sm:$0xff]   ;;  %v3764_v8 = vld [vmem:[#allocation5 + $0x240] ss:$28 sps:$4 sm:$0xff]  }
  0xb2   :  { %2435 = vmatpush1.bf16.xpose.msra.mxu1 %v3709_v9  ;;  %2476 = vmatpush1.bf16.xpose.msra.mxu0 %v3710_v10  ;;  %v3767_v9 = vld [vmem:[#allocation5 + $0x3f0] ss:$28 sps:$4 sm:$0xff]   ;;  %v3772_v10 = vld [vmem:[#allocation5 + $0x27c] ss:$28 sps:$4 sm:$0xff]  }
  0xb3   :  { %2486 = vmatprep.subr.bf16.mxu0 %v3714_v12  ;;  %3581 = vmatprep.subr.msk.bf16.mxu1 %vm2253_vm0, %v3715_v13  ;;  %v3770_v12 = vld [vmem:[#allocation5 + $0x278] ss:$28 sps:$4 sm:$0xff]   ;;  %v3773_v13 = vld [vmem:[#allocation5 + $0x428] ss:$28 sps:$4 sm:$0xff]  }
  0xb9   :  { %2437 = vmatmul.mubr.bf16.vlgmr.msra.gmra.mrb[0].mxu1 %v4293_v15  ;;  %2478 = vmatmul.mubr.bf16.vlgmr.msra.gmra.mrb[0].mxu0 %v4301_v20 }
  0xba   :  { %2487 = vmatpush1.bf16.xpose.msra.mxu0 %v3712_v18  ;;  %3469 = vmatpush3.bf16.xpose.msra.mxu1 %v2258_v21  ;;  %v3776_v18 = vld [vmem:[#allocation5 + $0x2b0] ss:$28 sps:$4 sm:$0xff]  }
  0xbb   :  { %2488 = vmatprep.subr.bf16.mxu0 %v3719_v22  ;;  %3582 = vmatprep.subr.msk.bf16.mxu1 %vm2253_vm0, %v3720_v23  ;;  %v3784_v21 = vld [vmem:[#allocation5 + $0x2ec] ss:$28 sps:$4 sm:$0xff]   ;;  %v3787_v22 = vld [vmem:[#allocation5 + $0x49c] ss:$28 sps:$4 sm:$0xff]  }
  0xbc   :  { %3484 = vmatprep.mubr.msk.bf16.mxu1 %vm2253_vm0, %v4306_v24  ;;  %2518 = vmatprep.mubr.bf16.mxu0 %v4309_v26  ;;  %v3782_v23 = vld [vmem:[#allocation5 + $0x2e8] ss:$28 sps:$4 sm:$0xff]  }
  0xc2   :  { %2489 = vmatpush1.bf16.xpose.msra.mxu0 %v3717_v28  ;;  %3471 = vmatpush3.bf16.xpose.msra.mxu1 %v2261_v29  ;;  %v3790_v28 = vld [vmem:[#allocation5 + $0x324] ss:$28 sps:$4 sm:$0xff]   ;;  %v3791_v29 = vld [vmem:[#allocation5 + $0x4d0] ss:$28 sps:$4 sm:$0xff]  }
  0xc3   :  { %2490 = vmatprep.subr.bf16.mxu0 %v3724_v30  ;;  %3583 = vmatprep.subr.msk.bf16.mxu1 %vm2253_vm0, %v3725_v31  ;;  %v3793_v30 = vld [vmem:[#allocation5 + $0x4d4] ss:$28 sps:$4 sm:$0xff]   ;;  %v3788_v31 = vld [vmem:[#allocation5 + $0x320] ss:$28 sps:$4 sm:$0xff]  }
  0xca   :  { %2491 = vmatpush1.bf16.xpose.msra.mxu0 %v3722_v33  ;;  %3473 = vmatpush3.bf16.xpose.msra.mxu1 %v2264_v36  ;;  %v3799_v33 = vld [vmem:[#allocation5 + $0x50c] ss:$28 sps:$4 sm:$0xff]   ;;  %v3802_v36 = vld [vmem:[#allocation5 + $0x544] ss:$28 sps:$4 sm:$0xff]  }
  0xcb   :  { %2492 = vmatprep.subr.bf16.mxu0 %v3729_v34  ;;  %3584 = vmatprep.subr.msk.bf16.mxu1 %vm2253_vm0, %v3730_v35  ;;  %v3794_v34 = vld [vmem:[#allocation5 + $0x358] ss:$28 sps:$4 sm:$0xff]   ;;  %v3797_v35 = vld [vmem:[#allocation5 + $0x508] ss:$28 sps:$4 sm:$0xff]  }
  0xd2   :  { %2493 = vmatpush1.bf16.xpose.msra.mxu0 %v3727_v39  ;;  %3475 = vmatpush3.bf16.xpose.msra.mxu1 %v2267_v43  ;;  %v3800_v39 = vld [vmem:[#allocation5 + $0x540] ss:$28 sps:$4 sm:$0xff]  }
  0xd3   :  { %2494 = vmatprep.subr.bf16.mxu0 %v3734_v41  ;;  %3585 = vmatprep.subr.msk.bf16.mxu1 %vm2253_vm0, %v3735_v42  ;;  %v3803_v41 = vld [vmem:[#allocation5 + $0x700] ss:$28 sps:$4 sm:$0xff]  }
  0xd4   :  { %v3808_v42 = vld [vmem:[#allocation5 + $0x57c] ss:$28 sps:$4 sm:$0xff]  }
  0xd5   :  { %v3811_v43 = vld [vmem:[#allocation5 + $0x73c] ss:$28 sps:$4 sm:$0xff]  }
  0xda   :  { %2495 = vmatpush1.bf16.xpose.msra.mxu0 %v3732_v45  ;;  %3477 = vmatpush3.bf16.xpose.msra.mxu1 %v2270_v48  ;;  %v3809_v45 = vld [vmem:[#allocation5 + $0x738] ss:$28 sps:$4 sm:$0xff]   ;;  %v3812_v48 = vld [vmem:[#allocation5 + $0x5b0] ss:$28 sps:$4 sm:$0xff]  }
  0xdb   :  { %2496 = vmatprep.subr.bf16.mxu0 %v3739_v46  ;;  %3586 = vmatprep.subr.msk.bf16.mxu1 %vm2253_vm0, %v3740_v47  ;;  %v3814_v46 = vld [vmem:[#allocation5 + $0x5b4] ss:$28 sps:$4 sm:$0xff]  }
  0xdc   :  { %v3817_v47 = vld [vmem:[#allocation5 + $0x774] ss:$28 sps:$4 sm:$0xff]  }
  0xe2   :  { %2497 = vmatpush1.bf16.xpose.msra.mxu0 %v3737_v50  ;;  %3479 = vmatpush3.bf16.xpose.msra.mxu1 %v2273_v53  ;;  %v3820_v50 = vld [vmem:[#allocation5 + $0x5ec] ss:$28 sps:$4 sm:$0xff]  }
  0xe3   :  { %2498 = vmatprep.subr.bf16.mxu0 %v3744_v51  ;;  %3587 = vmatprep.subr.msk.bf16.mxu1 %vm2253_vm0, %v3745_v52  ;;  %v3823_v51 = vld [vmem:[#allocation5 + $0x7ac] ss:$28 sps:$4 sm:$0xff]  }
  0xe4   :  { %v3818_v52 = vld [vmem:[#allocation5 + $0x5e8] ss:$28 sps:$4 sm:$0xff]  }
  0xe5   :  { %v3821_v53 = vld [vmem:[#allocation5 + $0x7a8] ss:$28 sps:$4 sm:$0xff]  }
  0xea   :  { %2499 = vmatpush1.bf16.xpose.msra.mxu0 %v3742_v55  ;;  %3481 = vmatpush3.bf16.xpose.msra.mxu1 %v2276_v58  ;;  %v3829_v55 = vld [vmem:[#allocation5 + $0x7e4] ss:$28 sps:$4 sm:$0xff]   ;;  %v3832_v58 = vld [vmem:[#allocation5 + $0x65c] ss:$28 sps:$4 sm:$0xff]  }
  0xeb   :  { %2500 = vmatprep.subr.bf16.mxu0 %v3749_v56  ;;  %3588 = vmatprep.subr.msk.bf16.mxu1 %vm2253_vm0, %v3750_v57  ;;  %v3824_v56 = vld [vmem:[#allocation5 + $0x620] ss:$28 sps:$4 sm:$0xff]  }
  0xec   :  { %v3827_v57 = vld [vmem:[#allocation5 + $0x7e0] ss:$28 sps:$4 sm:$0xff]  }
  0xf2   :  { %2501 = vmatpush1.bf16.xpose.msra.mxu0 %v3747_v60  ;;  %3483 = vmatpush3.bf16.xpose.msra.mxu1 %v2279_v61  ;;  %v3830_v60 = vld [vmem:[#allocation5 + $0x658] ss:$28 sps:$4 sm:$0xff]  }
  0xf3   :  { %2502 = vmatprep.subr.bf16.mxu0 %v3754_v62  ;;  %2568 = vmatprep.subr.bf16.mxu1 %v3757_v63  ;;  %v3833_v61 = vld [vmem:[#allocation5 + $0x818] ss:$28 sps:$4 sm:$0xff]  }
  0xf4   :  { %v3838_v62 = vld [vmem:[#allocation5 + $0x694] ss:$28 sps:$4 sm:$0xff]  }
  0xf5   :  { %v3841_v63 = vld [vmem:[#allocation5 + $0x854] ss:$28 sps:$4 sm:$0xff]  }
  0xf9   :  { %3485 = vmatmul.mubr.msk.bf16.vlgmr.msra.gmra.mrb[4].mxu1 %vm2253_vm0, %v4306_v24 }
  0xfa   :  { %2503 = vmatpush1.bf16.xpose.msra.mxu0 %v3752_v0  ;;  %2569 = vmatpush1.bf16.xpose.msra.mxu1 %v3755_v1  ;;  %v3836_v0 = vld [vmem:[#allocation5 + $0x690] ss:$28 sps:$4 sm:$0xff]  }
  0xfb   :  { %2504 = vmatprep.subr.bf16.mxu0 %v3760_v2  ;;  %2570 = vmatprep.subr.bf16.mxu1 %v3763_v3  ;;  %v3839_v1 = vld [vmem:[#allocation5 + $0x850] ss:$28 sps:$4 sm:$0xff]  }
  0xfc   :  { %2600 = vmatprep.mubr.bf16.mxu1 %v4280_v37  ;;  %v3844_v2 = vld [vmem:[#allocation5 + $0x6cc] ss:$28 sps:$4 sm:$0xff]  }
  0xfd   :  { %v3847_v3 = vld [vmem:[#allocation5 + $0x88c] ss:$28 sps:$4 sm:$0xff]  }
 0x102   :  { %2505 = vmatpush1.bf16.xpose.msra.mxu0 %v3758_v4  ;;  %2571 = vmatpush1.bf16.xpose.msra.mxu1 %v3761_v5  ;;  %v3842_v4 = vld [vmem:[#allocation5 + $0x6c8] ss:$28 sps:$4 sm:$0xff]  }
 0x103   :  { %2506 = vmatprep.subr.bf16.mxu0 %v3766_v6  ;;  %2572 = vmatprep.subr.bf16.mxu1 %v3769_v7  ;;  %v3845_v5 = vld [vmem:[#allocation5 + $0x888] ss:$28 sps:$4 sm:$0xff]  }
 0x104   :  { %v3850_v6 = vld [vmem:[#allocation5 + $0x38c] ss:$28 sps:$4 sm:$0xff]   ;;  %v3853_v7 = vld [vmem:[#allocation5 + $0x8c4] ss:$28 sps:$4 sm:$0xff]  }
 0x10a   :  { %2507 = vmatpush1.bf16.xpose.msra.mxu0 %v3764_v8  ;;  %2573 = vmatpush1.bf16.xpose.msra.mxu1 %v3767_v9  ;;  %v3848_v8 = vld [vmem:[#allocation5 + $0x388] ss:$28 sps:$4 sm:$0xff]   ;;  %v3851_v9 = vld [vmem:[#allocation5 + $0x8c0] ss:$28 sps:$4 sm:$0xff]  }
 0x10b   :  { %2508 = vmatprep.subr.bf16.mxu0 %v3772_v10  ;;  %2574 = vmatprep.subr.bf16.mxu1 %v3775_v11  ;;  %v3856_v10 = vld [vmem:[#allocation5 + $0x3c4] ss:$28 sps:$4 sm:$0xff]   ;;  %v3859_v11 = vld [vmem:[#allocation5 + $0x8fc] ss:$28 sps:$4 sm:$0xff]  }
 0x112   :  { %2509 = vmatpush1.bf16.xpose.msra.mxu0 %v3770_v12  ;;  %2575 = vmatpush1.bf16.xpose.msra.mxu1 %v3773_v13  ;;  %v3854_v12 = vld [vmem:[#allocation5 + $0x3c0] ss:$28 sps:$4 sm:$0xff]   ;;  %v3857_v13 = vld [vmem:[#allocation5 + $0x8f8] ss:$28 sps:$4 sm:$0xff]  }
 0x113   :  { %2510 = vmatprep.subr.bf16.mxu0 %v3778_v14  ;;  %2576 = vmatprep.subr.bf16.mxu1 %v3781_v16  ;;  %v3862_v14 = vld [vmem:[#allocation5 + $0x3fc] ss:$28 sps:$4 sm:$0xff]   ;;  %v3865_v16 = vld [vmem:[#allocation5 + $0x934] ss:$28 sps:$4 sm:$0xff]  }
 0x11a   :  { %2511 = vmatpush1.bf16.xpose.msra.mxu0 %v3776_v18  ;;  %2577 = vmatpush1.bf16.xpose.msra.mxu1 %v3779_v19  ;;  %v3860_v18 = vld [vmem:[#allocation5 + $0x3f8] ss:$28 sps:$4 sm:$0xff]   ;;  %v3863_v19 = vld [vmem:[#allocation5 + $0x930] ss:$28 sps:$4 sm:$0xff]  }
 0x11b   :  { %2512 = vmatprep.subr.bf16.mxu0 %v3784_v21  ;;  %2578 = vmatprep.subr.bf16.mxu1 %v3787_v22  ;;  %v3868_v21 = vld [vmem:[#allocation5 + $0x434] ss:$28 sps:$4 sm:$0xff]   ;;  %v3871_v22 = vld [vmem:[#allocation5 + $0x96c] ss:$28 sps:$4 sm:$0xff]  }
 0x122   :  { %2513 = vmatpush1.bf16.xpose.msra.mxu0 %v3782_v23  ;;  %2579 = vmatpush1.bf16.xpose.msra.mxu1 %v3785_v27 }
 0x123   :  { %2514 = vmatprep.subr.bf16.mxu0 %v3790_v28  ;;  %2580 = vmatprep.subr.bf16.mxu1 %v3793_v30  ;;  %v3866_v28 = vld [vmem:[#allocation5 + $0x430] ss:$28 sps:$4 sm:$0xff]   ;;  %v3869_v30 = vld [vmem:[#allocation5 + $0x968] ss:$28 sps:$4 sm:$0xff]  }
 0x12a   :  { %2515 = vmatpush1.bf16.xpose.msra.mxu0 %v3788_v31  ;;  %2581 = vmatpush1.bf16.xpose.msra.mxu1 %v3791_v29  ;;  %v3874_v29 = vld [vmem:[#allocation5 + $0x46c] ss:$28 sps:$4 sm:$0xff]  }
 0x12b   :  { %2516 = vmatprep.subr.bf16.mxu0 %v3796_v32  ;;  %2582 = vmatprep.subr.bf16.mxu1 %v3799_v33  ;;  %v3877_v32 = vld [vmem:[#allocation5 + $0x9a4] ss:$28 sps:$4 sm:$0xff]  }
 0x132   :  { %2517 = vmatpush1.bf16.xpose.msra.mxu0 %v3794_v34  ;;  %2583 = vmatpush1.bf16.xpose.msra.mxu1 %v3797_v35  ;;  %v3872_v34 = vld [vmem:[#allocation5 + $0x468] ss:$28 sps:$4 sm:$0xff]   ;;  %v3875_v35 = vld [vmem:[#allocation5 + $0x9a0] ss:$28 sps:$4 sm:$0xff]  }
 0x133   :  { %2584 = vmatprep.subr.bf16.mxu1 %v3802_v36  ;;  %2732 = vmatprep.subr.bf16.mxu0 %v3805_v38  ;;  %v3880_v36 = vld [vmem:[#allocation5 + $0x4a4] ss:$28 sps:$4 sm:$0xff]   ;;  %v3883_v38 = vld [vmem:[#allocation5 + $0x9dc] ss:$28 sps:$4 sm:$0xff]  }
 0x139   :  { %2519 = vmatmul.mubr.bf16.vlgmr.msra.gmra.mrb[0].mxu0 %v4297_v17 }
 0x13a   :  { %2585 = vmatpush1.bf16.xpose.msra.mxu1 %v3800_v39  ;;  %2733 = vmatpush1.bf16.xpose.msra.mxu0 %v3803_v41  ;;  %v3878_v39 = vld [vmem:[#allocation5 + $0x4a0] ss:$28 sps:$4 sm:$0xff]   ;;  %v3881_v41 = vld [vmem:[#allocation5 + $0x9d8] ss:$28 sps:$4 sm:$0xff]  }
 0x13b   :  { %2586 = vmatprep.subr.bf16.mxu1 %v3808_v42  ;;  %2734 = vmatprep.subr.bf16.mxu0 %v3811_v43  ;;  %v3886_v42 = vld [vmem:[#allocation5 + $0x4dc] ss:$28 sps:$4 sm:$0xff]   ;;  %v3889_v43 = vld [vmem:[#allocation5 + $0xa14] ss:$28 sps:$4 sm:$0xff]  }
 0x13c   :  { %2764 = vmatprep.mubr.bf16.mxu0 %v4280_v37 }
 0x142   :  { %2587 = vmatpush1.bf16.xpose.msra.mxu1 %v3806_v44  ;;  %2735 = vmatpush1.bf16.xpose.msra.mxu0 %v3809_v45  ;;  %v3884_v44 = vld [vmem:[#allocation5 + $0x4d8] ss:$28 sps:$4 sm:$0xff]   ;;  %v3887_v45 = vld [vmem:[#allocation5 + $0xa10] ss:$28 sps:$4 sm:$0xff]  }
 0x143   :  { %2588 = vmatprep.subr.bf16.mxu1 %v3814_v46  ;;  %2736 = vmatprep.subr.bf16.mxu0 %v3817_v47  ;;  %v3892_v46 = vld [vmem:[#allocation5 + $0x514] ss:$28 sps:$4 sm:$0xff]   ;;  %v3895_v47 = vld [vmem:[#allocation5 + $0xa4c] ss:$28 sps:$4 sm:$0xff]  }
 0x14a   :  { %2589 = vmatpush1.bf16.xpose.msra.mxu1 %v3812_v48  ;;  %2737 = vmatpush1.bf16.xpose.msra.mxu0 %v3815_v49  ;;  %v3890_v48 = vld [vmem:[#allocation5 + $0x510] ss:$28 sps:$4 sm:$0xff]   ;;  %v3893_v49 = vld [vmem:[#allocation5 + $0xa48] ss:$28 sps:$4 sm:$0xff]  }
 0x14b   :  { %2590 = vmatprep.subr.bf16.mxu1 %v3820_v50  ;;  %2738 = vmatprep.subr.bf16.mxu0 %v3823_v51  ;;  %v3898_v50 = vld [vmem:[#allocation5 + $0x54c] ss:$28 sps:$4 sm:$0xff]  }
 0x14c   :  { %v3901_v51 = vld [vmem:[#allocation5 + $0x70c] ss:$28 sps:$4 sm:$0xff]  }
 0x152   :  { %2591 = vmatpush1.bf16.xpose.msra.mxu1 %v3818_v52  ;;  %2739 = vmatpush1.bf16.xpose.msra.mxu0 %v3821_v53  ;;  %v3896_v52 = vld [vmem:[#allocation5 + $0x548] ss:$28 sps:$4 sm:$0xff]  }
 0x153   :  { %2592 = vmatprep.subr.bf16.mxu1 %v3826_v54  ;;  %2740 = vmatprep.subr.bf16.mxu0 %v3829_v55  ;;  %v3899_v53 = vld [vmem:[#allocation5 + $0x708] ss:$28 sps:$4 sm:$0xff]  }
 0x154   :  { %v3904_v54 = vld [vmem:[#allocation5 + $0x584] ss:$28 sps:$4 sm:$0xff]  }
 0x155   :  { %v3907_v55 = vld [vmem:[#allocation5 + $0x744] ss:$28 sps:$4 sm:$0xff]  }
 0x15a   :  { %2593 = vmatpush1.bf16.xpose.msra.mxu1 %v3824_v56  ;;  %2741 = vmatpush1.bf16.xpose.msra.mxu0 %v3827_v57  ;;  %v3902_v56 = vld [vmem:[#allocation5 + $0x580] ss:$28 sps:$4 sm:$0xff]  }
 0x15b   :  { %2594 = vmatprep.subr.bf16.mxu1 %v3832_v58  ;;  %2742 = vmatprep.subr.bf16.mxu0 %v3835_v59  ;;  %v3905_v57 = vld [vmem:[#allocation5 + $0x740] ss:$28 sps:$4 sm:$0xff]  }
 0x15c   :  { %v3910_v58 = vld [vmem:[#allocation5 + $0x5bc] ss:$28 sps:$4 sm:$0xff]  }
 0x15d   :  { %v3913_v59 = vld [vmem:[#allocation5 + $0x77c] ss:$28 sps:$4 sm:$0xff]  }
 0x162   :  { %2595 = vmatpush1.bf16.xpose.msra.mxu1 %v3830_v60  ;;  %2743 = vmatpush1.bf16.xpose.msra.mxu0 %v3833_v61  ;;  %v3908_v60 = vld [vmem:[#allocation5 + $0x5b8] ss:$28 sps:$4 sm:$0xff]  }
 0x163   :  { %2596 = vmatprep.subr.bf16.mxu1 %v3838_v62  ;;  %2744 = vmatprep.subr.bf16.mxu0 %v3841_v63  ;;  %v3911_v61 = vld [vmem:[#allocation5 + $0x778] ss:$28 sps:$4 sm:$0xff]  }
 0x164   :  { %v3916_v62 = vld [vmem:[#allocation5 + $0x5f4] ss:$28 sps:$4 sm:$0xff]  }
 0x165   :  { %v3919_v63 = vld [vmem:[#allocation5 + $0x7b4] ss:$28 sps:$4 sm:$0xff]  }
 0x16a   :  { %2597 = vmatpush1.bf16.xpose.msra.mxu1 %v3836_v0  ;;  %2745 = vmatpush1.bf16.xpose.msra.mxu0 %v3839_v1 }
 0x16b   :  { %2598 = vmatprep.subr.bf16.mxu1 %v3844_v2  ;;  %2746 = vmatprep.subr.bf16.mxu0 %v3847_v3  ;;  %v3914_v2 = vld [vmem:[#allocation5 + $0x5f0] ss:$28 sps:$4 sm:$0xff]  }
 0x16c   :  { %v3917_v3 = vld [vmem:[#allocation5 + $0x7b0] ss:$28 sps:$4 sm:$0xff]  }
 0x172   :  { %2599 = vmatpush1.bf16.xpose.msra.mxu1 %v3842_v4  ;;  %2747 = vmatpush1.bf16.xpose.msra.mxu0 %v3845_v5  ;;  %v3922_v5 = vld [vmem:[#allocation5 + $0x62c] ss:$28 sps:$4 sm:$0xff]  }
 0x173   :  { %2609 = vmatprep.subr.bf16.mxu1 %v3850_v6  ;;  %2748 = vmatprep.subr.bf16.mxu0 %v3853_v7  ;;  %v3925_v6 = vld [vmem:[#allocation5 + $0x7ec] ss:$28 sps:$4 sm:$0xff]  }
 0x179   :  { %2601 = vmatmul.mubr.bf16.vlgmr.msra.gmra.mrb[8].mxu1 %v4293_v15 }
 0x17a   :  { %2610 = vmatpush1.bf16.xpose.msra.mxu1 %v3848_v8  ;;  %2749 = vmatpush1.bf16.xpose.msra.mxu0 %v3851_v9  ;;  %v3920_v8 = vld [vmem:[#allocation5 + $0x628] ss:$28 sps:$4 sm:$0xff]  }
 0x17b   :  { %2611 = vmatprep.subr.bf16.mxu1 %v3856_v10  ;;  %2750 = vmatprep.subr.bf16.mxu0 %v3859_v11  ;;  %v3923_v9 = vld [vmem:[#allocation5 + $0x7e8] ss:$28 sps:$4 sm:$0xff]  }
 0x17c   :  { %2641 = vmatprep.mubr.bf16.mxu1 %v4285_v40  ;;  %v3928_v10 = vld [vmem:[#allocation5 + $0x664] ss:$28 sps:$4 sm:$0xff]  }
 0x17d   :  { %v3931_v11 = vld [vmem:[#allocation5 + $0x824] ss:$28 sps:$4 sm:$0xff]  }
 0x182   :  { %2612 = vmatpush1.bf16.xpose.msra.mxu1 %v3854_v12  ;;  %2751 = vmatpush1.bf16.xpose.msra.mxu0 %v3857_v13  ;;  %v3926_v12 = vld [vmem:[#allocation5 + $0x660] ss:$28 sps:$4 sm:$0xff]  }
 0x183   :  { %2613 = vmatprep.subr.bf16.mxu1 %v3862_v14  ;;  %2752 = vmatprep.subr.bf16.mxu0 %v3865_v16  ;;  %v3929_v13 = vld [vmem:[#allocation5 + $0x820] ss:$28 sps:$4 sm:$0xff]  }
 0x184   :  { %v3934_v14 = vld [vmem:[#allocation5 + $0x69c] ss:$28 sps:$4 sm:$0xff]  }
 0x185   :  { %v3937_v16 = vld [vmem:[#allocation5 + $0x85c] ss:$28 sps:$4 sm:$0xff]  }
 0x18a   :  { %2614 = vmatpush1.bf16.xpose.msra.mxu1 %v3860_v18  ;;  %2753 = vmatpush1.bf16.xpose.msra.mxu0 %v3863_v19  ;;  %v3932_v18 = vld [vmem:[#allocation5 + $0x698] ss:$28 sps:$4 sm:$0xff]  }
 0x18b   :  { %2615 = vmatprep.subr.bf16.mxu1 %v3868_v21  ;;  %2754 = vmatprep.subr.bf16.mxu0 %v3871_v22  ;;  %v3935_v19 = vld [vmem:[#allocation5 + $0x858] ss:$28 sps:$4 sm:$0xff]  }
 0x18c   :  { %v4337_v23 = vpop.f32.mrb[0].mxu1  ;;  %v3940_v21 = vld [vmem:[#allocation5 + $0x6d4] ss:$28 sps:$4 sm:$0xff]  }
 0x18d   :  { %v4339_v27 = vpop.f32.mrb[1].mxu1  ;;  %v3943_v22 = vld [vmem:[#allocation5 + $0x894] ss:$28 sps:$4 sm:$0xff]  }
 0x18e   :  { %v2442_v31 = vpop.f32.mrb[2].mxu1 }
 0x18f   :  { %v2443_v33 = vpop.f32.mrb[3].mxu1  ;;  %v3946_v31 = vld [vmem:[#allocation5 + $0x394] ss:$28 sps:$4 sm:$0xff]  }
 0x190   :  { %v3947_v33 = vld [vmem:[#allocation5 + $0x8c8] ss:$28 sps:$4 sm:$0xff]  }
 0x192   :  { %2616 = vmatpush1.bf16.xpose.msra.mxu1 %v3866_v28  ;;  %2755 = vmatpush1.bf16.xpose.msra.mxu0 %v3869_v30  ;;  %v3938_v28 = vld [vmem:[#allocation5 + $0x6d0] ss:$28 sps:$4 sm:$0xff]  }
 0x193   :  { %2617 = vmatprep.subr.bf16.mxu1 %v3874_v29  ;;  %2756 = vmatprep.subr.bf16.mxu0 %v3877_v32  ;;  %v3941_v30 = vld [vmem:[#allocation5 + $0x890] ss:$28 sps:$4 sm:$0xff]  }
 0x194   :  { %v3949_v29 = vld [vmem:[#allocation5 + $0x8cc] ss:$28 sps:$4 sm:$0xff]  }
 0x195   :  { %v3944_v32 = vld [vmem:[#allocation5 + $0x390] ss:$28 sps:$4 sm:$0xff]  }
 0x19a   :  { %2618 = vmatpush1.bf16.xpose.msra.mxu1 %v3872_v34  ;;  %2757 = vmatpush1.bf16.xpose.msra.mxu0 %v3875_v35  ;;  %v3952_v34 = vld [vmem:[#allocation5 + $0x3cc] ss:$28 sps:$4 sm:$0xff]   ;;  %v3955_v35 = vld [vmem:[#allocation5 + $0x904] ss:$28 sps:$4 sm:$0xff]  }
 0x19b   :  { %2619 = vmatprep.subr.bf16.mxu1 %v3880_v36  ;;  %2758 = vmatprep.subr.bf16.mxu0 %v3883_v38  ;;  %v3950_v36 = vld [vmem:[#allocation5 + $0x3c8] ss:$28 sps:$4 sm:$0xff]   ;;  %v3953_v38 = vld [vmem:[#allocation5 + $0x900] ss:$28 sps:$4 sm:$0xff]  }
 0x1a2   :  { %2620 = vmatpush1.bf16.xpose.msra.mxu1 %v3878_v39  ;;  %2759 = vmatpush1.bf16.xpose.msra.mxu0 %v3881_v41  ;;  %v3958_v39 = vld [vmem:[#allocation5 + $0x404] ss:$28 sps:$4 sm:$0xff]   ;;  %v3961_v41 = vld [vmem:[#allocation5 + $0x93c] ss:$28 sps:$4 sm:$0xff]  }
 0x1a3   :  { %2621 = vmatprep.subr.bf16.mxu1 %v3886_v42  ;;  %2760 = vmatprep.subr.bf16.mxu0 %v3889_v43  ;;  %v450_v42 = vsub.s32 0, %v4266_v25  ;;  %v4350_v43 = vld [vmem:[#allocation7] sm:$0x7f] }
 0x1aa   :  { %2622 = vmatpush1.bf16.xpose.msra.mxu1 %v3884_v44  ;;  %2761 = vmatpush1.bf16.xpose.msra.mxu0 %v3887_v45  ;;  %v454_v44 = vsub.s32 1, %v4266_v25  ;;  %v3956_v45 = vld [vmem:[#allocation5 + $0x400] ss:$28 sps:$4 sm:$0xff]  }
 0x1ab   :  { %2623 = vmatprep.subr.bf16.mxu1 %v3892_v46  ;;  %2762 = vmatprep.subr.bf16.mxu0 %v3895_v47  ;;  %v3959_v46 = vld [vmem:[#allocation5 + $0x938] ss:$28 sps:$4 sm:$0xff]   ;;  %v451_v47 = vrot.slane %v4350_v43, %v450_v42  ;;  %v4016_v42 = vld [vmem:[#allocation5 + $0x630] ss:$28 sps:$4 sm:$0xff]  }
 0x1b2   :  { %2624 = vmatpush1.bf16.xpose.msra.mxu1 %v3890_v48  ;;  %2763 = vmatpush1.bf16.xpose.msra.mxu0 %v3893_v49  ;;  %v3964_v48 = vld [vmem:[#allocation5 + $0x43c] ss:$28 sps:$4 sm:$0xff]   ;;  %v3967_v49 = vld [vmem:[#allocation5 + $0x974] ss:$28 sps:$4 sm:$0xff]  }
 0x1b3   :  { %2625 = vmatprep.subr.bf16.mxu1 %v3898_v50  ;;  %2773 = vmatprep.subr.bf16.mxu0 %v3901_v51  ;;  %v455_v50 = vrot.slane %v4350_v43, %v454_v44  ;;  %v2439_v51 = vadd.f32 %v4337_v23, %v451_v47  ;;  %v4019_v44 = vld [vmem:[#allocation5 + $0x7f0] ss:$28 sps:$4 sm:$0xff]   ;;  %v4022_v47 = vld [vmem:[#allocation5 + $0x668] ss:$28 sps:$4 sm:$0xff]  }
 0x1b9   :  { %2765 = vmatmul.mubr.bf16.vlgmr.msra.gmra.mrb[4].mxu0 %v4293_v15 }
 0x1ba   :  { %2626 = vmatpush1.bf16.xpose.msra.mxu1 %v3896_v52  ;;  %2774 = vmatpush1.bf16.xpose.msra.mxu0 %v3899_v53  ;;  %v2441_v52 = vadd.f32 %v4339_v27, %v455_v50  ;;  %v3968_v27 = vld [vmem:[#allocation5 + $0x470] ss:$28 sps:$4 sm:$0xff]   ;;  %v4033_v50 = vld [vmem:[#allocation5 + $0x864] ss:$28 sps:$4 sm:$0xff]  }
 0x1bb   :  { %2627 = vmatprep.subr.bf16.mxu1 %v3904_v54  ;;  %2775 = vmatprep.subr.bf16.mxu0 %v3907_v55 }
 0x1bc   :  { %2805 = vmatprep.mubr.bf16.mxu0 %v4285_v40 }
 0x1c2   :  { %2628 = vmatpush1.bf16.xpose.msra.mxu1 %v3902_v56  ;;  %2776 = vmatpush1.bf16.xpose.msra.mxu0 %v3905_v57 }
 0x1c3   :  { %2629 = vmatprep.subr.bf16.mxu1 %v3910_v58  ;;  %2777 = vmatprep.subr.bf16.mxu0 %v3913_v59  ;;  %v3962_v58 = vld [vmem:[#allocation5 + $0x438] ss:$28 sps:$4 sm:$0xff]   ;;  %v3965_v59 = vld [vmem:[#allocation5 + $0x970] ss:$28 sps:$4 sm:$0xff]  }
 0x1ca   :  { %2630 = vmatpush1.bf16.xpose.msra.mxu1 %v3908_v60  ;;  %2778 = vmatpush1.bf16.xpose.msra.mxu0 %v3911_v61 }
 0x1cb   :  { %2631 = vmatprep.subr.bf16.mxu1 %v3916_v62  ;;  %2779 = vmatprep.subr.bf16.mxu0 %v3919_v63  ;;  %v3970_v62 = vld [vmem:[#allocation5 + $0x474] ss:$28 sps:$4 sm:$0xff]   ;;  %v3973_v63 = vld [vmem:[#allocation5 + $0x9ac] ss:$28 sps:$4 sm:$0xff]  }
 0x1cc   :  { %v4343_v0 = vpop.f32.mrb[4].mxu1 }
 0x1cd   :  { %v4345_v1 = vpop.f32.mrb[5].mxu1 }
 0x1ce   :  { %v2565_v4 = vpop.f32.mrb[6].mxu1 }
 0x1cf   :  { %v2566_v7 = vpop.f32.mrb[7].mxu1  ;;  %v3976_v4 = vld [vmem:[#allocation5 + $0x4ac] ss:$28 sps:$4 sm:$0xff]  }
 0x1d0   :  { %v3982_v7 = vld [vmem:[#allocation5 + $0x4e4] ss:$28 sps:$4 sm:$0xff]  }
 0x1d2   :  { %2632 = vmatpush1.bf16.xpose.msra.mxu1 %v3914_v2  ;;  %2780 = vmatpush1.bf16.xpose.msra.mxu0 %v3917_v3  ;;  %v3971_v3 = vld [vmem:[#allocation5 + $0x9a8] ss:$28 sps:$4 sm:$0xff]  }
 0x1d3   :  { %2633 = vmatprep.subr.bf16.mxu1 %v3922_v5  ;;  %2781 = vmatprep.subr.bf16.mxu0 %v3925_v6  ;;  %v3979_v5 = vld [vmem:[#allocation5 + $0x9e4] ss:$28 sps:$4 sm:$0xff]  }
 0x1d4   :  { %v3977_v6 = vld [vmem:[#allocation5 + $0x9e0] ss:$28 sps:$4 sm:$0xff]  }
 0x1da   :  { %2634 = vmatpush1.bf16.xpose.msra.mxu1 %v3920_v8  ;;  %2782 = vmatpush1.bf16.xpose.msra.mxu0 %v3923_v9  ;;  %v3980_v8 = vld [vmem:[#allocation5 + $0x4e0] ss:$28 sps:$4 sm:$0xff]   ;;  %v3983_v9 = vld [vmem:[#allocation5 + $0xa18] ss:$28 sps:$4 sm:$0xff]  }
 0x1db   :  { %2635 = vmatprep.subr.bf16.mxu1 %v3928_v10  ;;  %2783 = vmatprep.subr.bf16.mxu0 %v3931_v11  ;;  %v3988_v10 = vld [vmem:[#allocation5 + $0x51c] ss:$28 sps:$4 sm:$0xff]   ;;  %v3991_v11 = vld [vmem:[#allocation5 + $0xa54] ss:$28 sps:$4 sm:$0xff]  }
 0x1e2   :  { %2636 = vmatpush1.bf16.xpose.msra.mxu1 %v3926_v12  ;;  %2784 = vmatpush1.bf16.xpose.msra.mxu0 %v3929_v13  ;;  %v3986_v12 = vld [vmem:[#allocation5 + $0x518] ss:$28 sps:$4 sm:$0xff]   ;;  %v3989_v13 = vld [vmem:[#allocation5 + $0xa50] ss:$28 sps:$4 sm:$0xff]  }
 0x1e3   :  { %2637 = vmatprep.subr.bf16.mxu1 %v3934_v14  ;;  %2785 = vmatprep.subr.bf16.mxu0 %v3937_v16  ;;  %v3994_v14 = vld [vmem:[#allocation5 + $0x554] ss:$28 sps:$4 sm:$0xff]  }
 0x1e4   :  { %v3997_v16 = vld [vmem:[#allocation5 + $0x714] ss:$28 sps:$4 sm:$0xff]  }
 0x1ea   :  { %2638 = vmatpush1.bf16.xpose.msra.mxu1 %v3932_v18  ;;  %2786 = vmatpush1.bf16.xpose.msra.mxu0 %v3935_v19  ;;  %v3992_v18 = vld [vmem:[#allocation5 + $0x550] ss:$28 sps:$4 sm:$0xff]  }
 0x1eb   :  { %2639 = vmatprep.subr.bf16.mxu1 %v3940_v21  ;;  %2787 = vmatprep.subr.bf16.mxu0 %v3943_v22  ;;  %v3995_v19 = vld [vmem:[#allocation5 + $0x710] ss:$28 sps:$4 sm:$0xff]  }
 0x1ec   :  { %v4000_v21 = vld [vmem:[#allocation5 + $0x58c] ss:$28 sps:$4 sm:$0xff]  }
 0x1ed   :  { %v4003_v22 = vld [vmem:[#allocation5 + $0x74c] ss:$28 sps:$4 sm:$0xff]  }
 0x1f2   :  { %2640 = vmatpush1.bf16.xpose.msra.mxu1 %v3938_v28  ;;  %2788 = vmatpush1.bf16.xpose.msra.mxu0 %v3941_v30  ;;  %v3998_v28 = vld [vmem:[#allocation5 + $0x588] ss:$28 sps:$4 sm:$0xff]  }
 0x1f3   :  { %2650 = vmatprep.subr.bf16.mxu1 %v3946_v31  ;;  %2789 = vmatprep.subr.bf16.mxu0 %v3949_v29  ;;  %v4001_v30 = vld [vmem:[#allocation5 + $0x748] ss:$28 sps:$4 sm:$0xff]  }
 0x1f4   :  { %v4006_v31 = vld [vmem:[#allocation5 + $0x5c4] ss:$28 sps:$4 sm:$0xff]  }
 0x1f5   :  { %v4009_v29 = vld [vmem:[#allocation5 + $0x784] ss:$28 sps:$4 sm:$0xff]  }
 0x1f9   :  { %2642 = vmatmul.mubr.bf16.vlgmr.msra.gmra.mrb[8].mxu1 %v4301_v20 }
 0x1fa   :  { %2651 = vmatpush1.bf16.xpose.msra.mxu1 %v3944_v32  ;;  %2790 = vmatpush1.bf16.xpose.msra.mxu0 %v3947_v33  ;;  %v4004_v32 = vld [vmem:[#allocation5 + $0x5c0] ss:$28 sps:$4 sm:$0xff]  }
 0x1fb   :  { %2652 = vmatprep.subr.bf16.mxu1 %v3952_v34  ;;  %2791 = vmatprep.subr.bf16.mxu0 %v3955_v35  ;;  %v4007_v33 = vld [vmem:[#allocation5 + $0x780] ss:$28 sps:$4 sm:$0xff]  }
 0x1fc   :  { %2682 = vmatprep.mubr.bf16.mxu1 %v4309_v26  ;;  %v4012_v34 = vld [vmem:[#allocation5 + $0x5fc] ss:$28 sps:$4 sm:$0xff]  }
 0x1fd   :  { %v4015_v35 = vld [vmem:[#allocation5 + $0x7bc] ss:$28 sps:$4 sm:$0xff]  }
 0x202   :  { %2653 = vmatpush1.bf16.xpose.msra.mxu1 %v3950_v36  ;;  %2792 = vmatpush1.bf16.xpose.msra.mxu0 %v3953_v38  ;;  %v4010_v36 = vld [vmem:[#allocation5 + $0x5f8] ss:$28 sps:$4 sm:$0xff]  }
 0x203   :  { %2654 = vmatprep.subr.bf16.mxu1 %v3958_v39  ;;  %2793 = vmatprep.subr.bf16.mxu0 %v3961_v41  ;;  %v4013_v38 = vld [vmem:[#allocation5 + $0x7b8] ss:$28 sps:$4 sm:$0xff]  }
 0x204   :  { %v4018_v39 = vld [vmem:[#allocation5 + $0x634] ss:$28 sps:$4 sm:$0xff]  }
 0x205   :  { %v4021_v41 = vld [vmem:[#allocation5 + $0x7f4] ss:$28 sps:$4 sm:$0xff]  }
 0x20a   :  { %2655 = vmatpush1.bf16.xpose.msra.mxu1 %v3956_v45  ;;  %2794 = vmatpush1.bf16.xpose.msra.mxu0 %v3959_v46  ;;  %v4024_v45 = vld [vmem:[#allocation5 + $0x66c] ss:$28 sps:$4 sm:$0xff]  }
 0x20b   :  { %2656 = vmatprep.subr.bf16.mxu1 %v3964_v48  ;;  %2795 = vmatprep.subr.bf16.mxu0 %v3967_v49  ;;  %v4027_v46 = vld [vmem:[#allocation5 + $0x82c] ss:$28 sps:$4 sm:$0xff]   ;;  %v4030_v49 = vld [vmem:[#allocation5 + $0x6a4] ss:$28 sps:$4 sm:$0xff]  }
 0x20c   :  { %v2520_v53 = vpop.f32.mrb[0].mxu0  ;;  %v4025_v48 = vld [vmem:[#allocation5 + $0x828] ss:$28 sps:$4 sm:$0xff]  }
 0x20d   :  { %v3531_v54 = vadd.f32 %v2520_v53, %v2439_v51  ;;  %v2522_v55 = vpop.f32.mrb[1].mxu0  ;;  %v4028_v51 = vld [vmem:[#allocation5 + $0x6a0] ss:$28 sps:$4 sm:$0xff]  }
 0x20e   :  { %v3534_v56 = vadd.f32 %v2522_v55, %v2441_v52  ;;  %v2524_v57 = vpop.f32.mrb[2].mxu0  ;;  %v4031_v52 = vld [vmem:[#allocation5 + $0x860] ss:$28 sps:$4 sm:$0xff]   ;;  %v4034_v55 = vld [vmem:[#allocation5 + $0x6d8] ss:$28 sps:$4 sm:$0xff]  }
 0x20f   :  { %v4358_v60 = vadd.f32 %v3531_v54, %v4343_v0  ;;  %v2525_v61 = vpop.f32.mrb[3].mxu0  ;;  %v3974_v0 = vld [vmem:[#allocation5 + $0x4a8] ss:$28 sps:$4 sm:$0xff]   ;;  %v4036_v53 = vld [vmem:[#allocation5 + $0x6dc] ss:$28 sps:$4 sm:$0xff]  }
 0x210   :  { %v4361_v2 = vadd.f32 %v3534_v56, %v4345_v1  ;;  %v3985_v1 = vld [vmem:[#allocation5 + $0xa1c] ss:$28 sps:$4 sm:$0xff]   ;;  %v4041_v61 = vld [vmem:[#allocation5 + $0x8d0] ss:$28 sps:$4 sm:$0xff]  }
 0x211   :  { %v4039_v54 = vld [vmem:[#allocation5 + $0x89c] ss:$28 sps:$4 sm:$0xff]  }
 0x212   :  { %v3063_v23 = vcombine.low %v4358_v60, %v4361_v2  ;;  %2657 = vmatpush1.bf16.xpose.msra.mxu1 %v3962_v58  ;;  %2796 = vmatpush1.bf16.xpose.msra.mxu0 %v3965_v59  ;;  %v4037_v56 = vld [vmem:[#allocation5 + $0x898] ss:$28 sps:$4 sm:$0xff]  }
 0x213   :  { %2658 = vmatprep.subr.bf16.mxu1 %v3970_v62  ;;  %2797 = vmatprep.subr.bf16.mxu0 %v3973_v63  ;;  %v4040_v57 = vld [vmem:[#allocation5 + $0x558] ss:$28 sps:$4 sm:$0xff]   ;;  %v4045_v63 = vld [vmem:[#allocation5 + $0x590] ss:$28 sps:$4 sm:$0xff]  }
 0x214   :  { %v4043_v58 = vld [vmem:[#allocation5 + $0x8d4] ss:$28 sps:$4 sm:$0xff]  }
 0x215   :  { %v4044_v59 = vld [vmem:[#allocation5 + $0x398] ss:$28 sps:$4 sm:$0xff]  }
 0x216   :  { %v2306_v62 = vsel %vm2253_vm0, %v4044_v59, 0  ;;  %v4093_v59 = vld [vmem:[#allocation5 + $0xa90] ss:$28 sps:$4 sm:$0xff]  }
 0x21a   :  { %2659 = vmatpush1.bf16.xpose.msra.mxu1 %v3968_v27  ;;  %2798 = vmatpush1.bf16.xpose.msra.mxu0 %v3971_v3  ;;  %v4048_v27 = vld [vmem:[#allocation5 + $0x90c] ss:$28 sps:$4 sm:$0xff]  }
 0x21b   :  { %2660 = vmatprep.subr.bf16.mxu1 %v3976_v4  ;;  %2799 = vmatprep.subr.bf16.mxu0 %v3979_v5  ;;  %v4049_v3 = vld [vmem:[#allocation5 + $0x3d0] ss:$28 sps:$4 sm:$0xff]   ;;  %v4046_v4 = vld [vmem:[#allocation5 + $0x908] ss:$28 sps:$4 sm:$0xff]  }
 0x21c   :  { %v2309_v5 = vsel %vm2253_vm0, %v4049_v3, 0 }
 0x222   :  { %2661 = vmatpush1.bf16.xpose.msra.mxu1 %v3974_v0  ;;  %2800 = vmatpush1.bf16.xpose.msra.mxu0 %v3977_v6  ;;  %v4050_v0 = vld [vmem:[#allocation5 + $0x5c8] ss:$28 sps:$4 sm:$0xff]  }
 0x223   :  { %2662 = vmatprep.subr.bf16.mxu1 %v3982_v7  ;;  %2801 = vmatprep.subr.bf16.mxu0 %v3985_v1  ;;  %v4053_v6 = vld [vmem:[#allocation5 + $0x944] ss:$28 sps:$4 sm:$0xff]  }
 0x224   :  { %v4054_v7 = vld [vmem:[#allocation5 + $0x408] ss:$28 sps:$4 sm:$0xff]   ;;  %v4051_v1 = vld [vmem:[#allocation5 + $0x940] ss:$28 sps:$4 sm:$0xff]  }
 0x22a   :  { %2663 = vmatpush1.bf16.xpose.msra.mxu1 %v3980_v8  ;;  %2802 = vmatpush1.bf16.xpose.msra.mxu0 %v3983_v9  ;;  %v2312_v8 = vsel %vm2253_vm0, %v4054_v7, 0  ;;  %v4055_v9 = vld [vmem:[#allocation5 + $0x600] ss:$28 sps:$4 sm:$0xff]  }
 0x22b   :  { %2664 = vmatprep.subr.bf16.mxu1 %v3988_v10  ;;  %2803 = vmatprep.subr.bf16.mxu0 %v3991_v11  ;;  %v4058_v10 = vld [vmem:[#allocation5 + $0x97c] ss:$28 sps:$4 sm:$0xff]  }
 0x22c   :  { %v4059_v11 = vld [vmem:[#allocation5 + $0x440] ss:$28 sps:$4 sm:$0xff]  }
 0x232   :  { %2665 = vmatpush1.bf16.xpose.msra.mxu1 %v3986_v12  ;;  %2804 = vmatpush1.bf16.xpose.msra.mxu0 %v3989_v13  ;;  %v4056_v12 = vld [vmem:[#allocation5 + $0x978] ss:$28 sps:$4 sm:$0xff]   ;;  %v2315_v13 = vsel %vm2253_vm0, %v4059_v11, 0 }
 0x233   :  { %2666 = vmatprep.subr.bf16.mxu1 %v3994_v14  ;;  %2814 = vmatprep.subr.bf16.mxu0 %v3997_v16  ;;  %v4060_v14 = vld [vmem:[#allocation5 + $0x638] ss:$28 sps:$4 sm:$0xff]  }
 0x234   :  { %v4063_v16 = vld [vmem:[#allocation5 + $0x9b4] ss:$28 sps:$4 sm:$0xff]  }
 0x239   :  { %2806 = vmatmul.mubr.bf16.vlgmr.msra.gmra.mrb[4].mxu0 %v4301_v20 }
 0x23a   :  { %2667 = vmatpush1.bf16.xpose.msra.mxu1 %v3992_v18  ;;  %2815 = vmatpush1.bf16.xpose.msra.mxu0 %v3995_v19  ;;  %v4064_v18 = vld [vmem:[#allocation5 + $0x478] ss:$28 sps:$4 sm:$0xff]   ;;  %v4061_v19 = vld [vmem:[#allocation5 + $0x9b0] ss:$28 sps:$4 sm:$0xff]  }
 0x23b   :  { %2668 = vmatprep.subr.bf16.mxu1 %v4000_v21  ;;  %2816 = vmatprep.subr.bf16.mxu0 %v4003_v22  ;;  %v2318_v21 = vsel %vm2253_vm0, %v4064_v18, 0  ;;  %v4065_v22 = vld [vmem:[#allocation5 + $0x670] ss:$28 sps:$4 sm:$0xff]  }
 0x23c   :  { %2846 = vmatprep.mubr.bf16.mxu0 %v4309_v26 }
 0x242   :  { %2669 = vmatpush1.bf16.xpose.msra.mxu1 %v3998_v28  ;;  %2817 = vmatpush1.bf16.xpose.msra.mxu0 %v4001_v30  ;;  %v4068_v28 = vld [vmem:[#allocation5 + $0x9ec] ss:$28 sps:$4 sm:$0xff]  }
 0x243   :  { %2670 = vmatprep.subr.bf16.mxu1 %v4006_v31  ;;  %2818 = vmatprep.subr.bf16.mxu0 %v4009_v29  ;;  %v4069_v30 = vld [vmem:[#allocation5 + $0x4b0] ss:$28 sps:$4 sm:$0xff]   ;;  %v4066_v31 = vld [vmem:[#allocation5 + $0x9e8] ss:$28 sps:$4 sm:$0xff]  }
 0x244   :  { %v2321_v29 = vsel %vm2253_vm0, %v4069_v30, 0 }
 0x24a   :  { %2671 = vmatpush1.bf16.xpose.msra.mxu1 %v4004_v32  ;;  %2819 = vmatpush1.bf16.xpose.msra.mxu0 %v4007_v33  ;;  %v4070_v32 = vld [vmem:[#allocation5 + $0x6a8] ss:$28 sps:$4 sm:$0xff]  }
 0x24b   :  { %2672 = vmatprep.subr.bf16.mxu1 %v4012_v34  ;;  %2820 = vmatprep.subr.bf16.mxu0 %v4015_v35  ;;  %v4073_v33 = vld [vmem:[#allocation5 + $0xa24] ss:$28 sps:$4 sm:$0xff]  }
 0x24c   :  { %v4074_v34 = vld [vmem:[#allocation5 + $0x4e8] ss:$28 sps:$4 sm:$0xff]   ;;  %v4071_v35 = vld [vmem:[#allocation5 + $0xa20] ss:$28 sps:$4 sm:$0xff]  }
 0x252   :  { %2673 = vmatpush1.bf16.xpose.msra.mxu1 %v4010_v36  ;;  %2821 = vmatpush1.bf16.xpose.msra.mxu0 %v4013_v38  ;;  %v2324_v36 = vsel %vm2253_vm0, %v4074_v34, 0  ;;  %v4075_v38 = vld [vmem:[#allocation5 + $0x6e0] ss:$28 sps:$4 sm:$0xff]   ;;  %v474_v34 = vsub.s32 6, %v4266_v25 }
 0x253   :  { %2674 = vmatprep.subr.bf16.mxu1 %v4018_v39  ;;  %2822 = vmatprep.subr.bf16.mxu0 %v4021_v41  ;;  %v4078_v39 = vld [vmem:[#allocation5 + $0xa5c] ss:$28 sps:$4 sm:$0xff]  }
 0x254   :  { %v4079_v41 = vld [vmem:[#allocation5 + $0x520] ss:$28 sps:$4 sm:$0xff]  }
 0x25a   :  { %2675 = vmatpush1.bf16.xpose.msra.mxu1 %v4016_v42  ;;  %2823 = vmatpush1.bf16.xpose.msra.mxu0 %v4019_v44  ;;  %v4076_v42 = vld [vmem:[#allocation5 + $0xa58] ss:$28 sps:$4 sm:$0xff]   ;;  %v2327_v44 = vsel %vm2253_vm0, %v4079_v41, 0 }
 0x25b   :  { %2676 = vmatprep.subr.bf16.mxu1 %v4024_v45  ;;  %2824 = vmatprep.subr.bf16.mxu0 %v4027_v46  ;;  %v4080_v45 = vld [vmem:[#allocation5 + $0x8d8] ss:$28 sps:$4 sm:$0xff]   ;;  %v4083_v46 = vld [vmem:[#allocation5 + $0xa84] ss:$28 sps:$4 sm:$0xff]  }
 0x262   :  { %2677 = vmatpush1.bf16.xpose.msra.mxu1 %v4022_v47  ;;  %2825 = vmatpush1.bf16.xpose.msra.mxu0 %v4025_v48  ;;  %v4084_v47 = vld [vmem:[#allocation5 + $0x718] ss:$28 sps:$4 sm:$0xff]   ;;  %v4081_v48 = vld [vmem:[#allocation5 + $0xa80] ss:$28 sps:$4 sm:$0xff]  }
 0x263   :  { %2678 = vmatprep.subr.bf16.mxu1 %v4030_v49  ;;  %2826 = vmatprep.subr.bf16.mxu0 %v4033_v50  ;;  %v2354_v49 = vsel %vm2253_vm0, %v4084_v47, 0  ;;  %v4085_v50 = vld [vmem:[#allocation5 + $0x910] ss:$28 sps:$4 sm:$0xff]  }
 0x26a   :  { %2679 = vmatpush1.bf16.xpose.msra.mxu1 %v4028_v51  ;;  %2827 = vmatpush1.bf16.xpose.msra.mxu0 %v4031_v52  ;;  %v4089_v51 = vld [vmem:[#allocation5 + $0xa8c] ss:$28 sps:$4 sm:$0xff]  }
 0x26b   :  { %2680 = vmatprep.subr.bf16.mxu1 %v4036_v53  ;;  %2828 = vmatprep.subr.bf16.mxu0 %v4039_v54  ;;  %v4086_v52 = vld [vmem:[#allocation5 + $0x750] ss:$28 sps:$4 sm:$0xff]   ;;  %v4087_v53 = vld [vmem:[#allocation5 + $0xa88] ss:$28 sps:$4 sm:$0xff]  }
 0x26c   :  { %v2357_v54 = vsel %vm2253_vm0, %v4086_v52, 0 }
 0x272   :  { %2681 = vmatpush1.bf16.xpose.msra.mxu1 %v4034_v55  ;;  %2829 = vmatpush1.bf16.xpose.msra.mxu0 %v4037_v56  ;;  %v4090_v55 = vld [vmem:[#allocation5 + $0x948] ss:$28 sps:$4 sm:$0xff]   ;;  %v4095_v56 = vld [vmem:[#allocation5 + $0xa94] ss:$28 sps:$4 sm:$0xff]  }
 0x273   :  { %3589 = vmatprep.subr.msk.bf16.mxu1 %vm2253_vm0, %v4040_v57  ;;  %2830 = vmatprep.subr.bf16.mxu0 %v4043_v58  ;;  %v4091_v57 = vld [vmem:[#allocation5 + $0x788] ss:$28 sps:$4 sm:$0xff]   ;;  %v4092_v58 = vld [vmem:[#allocation5 + $0x980] ss:$28 sps:$4 sm:$0xff]  }
 0x279   :  { %2683 = vmatmul.mubr.bf16.vlgmr.msra.gmra.mrb[8].mxu1 %v4297_v17 }
 0x27a   :  { %3487 = vmatpush3.bf16.xpose.msra.mxu1 %v2306_v62  ;;  %2831 = vmatpush1.bf16.xpose.msra.mxu0 %v4041_v61  ;;  %v4096_v61 = vld [vmem:[#allocation5 + $0x7c0] ss:$28 sps:$4 sm:$0xff]   ;;  %v4097_v62 = vld [vmem:[#allocation5 + $0x9b8] ss:$28 sps:$4 sm:$0xff]  }
 0x27b   :  { %3590 = vmatprep.subr.msk.bf16.mxu1 %vm2253_vm0, %v4045_v63  ;;  %2832 = vmatprep.subr.bf16.mxu0 %v4048_v27  ;;  %v4206_v63 = vmov 0.0   ;;  %v4099_v27 = vld [vmem:[#allocation5 + $0xa98] ss:$28 sps:$4 sm:$0xff]  }
 0x27c   :  { %3502 = vmatprep.mubr.msk.bf16.mxu1 %vm2253_vm0, %v4306_v24 }
 0x282   :  { %3489 = vmatpush3.bf16.xpose.msra.mxu1 %v2309_v5  ;;  %2833 = vmatpush1.bf16.xpose.msra.mxu0 %v4046_v4  ;;  %v2402_v4 = vsel %vm2253_vm0, %v4099_v27, 0  ;;  %v4100_v5 = vld [vmem:[#allocation5 + $0x9f0] ss:$28 sps:$4 sm:$0xff]  }
 0x283   :  { %3591 = vmatprep.subr.msk.bf16.mxu1 %vm2253_vm0, %v4050_v0  ;;  %2834 = vmatprep.subr.bf16.mxu0 %v4053_v6  ;;  %v4102_v0 = vld [vmem:[#allocation5 + $0xa28] ss:$28 sps:$4 sm:$0xff]  }
 0x284   :  { %v4103_v6 = vld [vmem:[#allocation5 + $0x868] ss:$28 sps:$4 sm:$0xff]  }
 0x285   :  { %v2372_v7 = vsel %vm2253_vm0, %v4103_v6, 0 }
 0x28a   :  { %3491 = vmatpush3.bf16.xpose.msra.mxu1 %v2312_v8  ;;  %2835 = vmatpush1.bf16.xpose.msra.mxu0 %v4051_v1  ;;  %v4105_v1 = vld [vmem:[#allocation5 + $0x8a0] ss:$28 sps:$4 sm:$0xff]  }
 0x28b   :  { %3592 = vmatprep.subr.msk.bf16.mxu1 %vm2253_vm0, %v4055_v9  ;;  %2836 = vmatprep.subr.bf16.mxu0 %v4058_v10  ;;  %v2375_v8 = vsel %vm2253_vm0, %v4105_v1, 0  ;;  %v458_v9 = vsub.s32 2, %v4266_v25  ;;  %v4208_v10 = vmov 1983009808  }
 0x28c   :  { %v3066_v11 = vunpack.c.l.s4 %v4208_v10 }
 0x292   :  { %3493 = vmatpush3.bf16.xpose.msra.mxu1 %v2315_v13  ;;  %2837 = vmatpush1.bf16.xpose.msra.mxu0 %v4056_v12  ;;  %v462_v12 = vsub.s32 3, %v4266_v25  ;;  %v459_v13 = vrot.slane %v4350_v43, %v458_v9 }
 0x293   :  { %3593 = vmatprep.subr.msk.bf16.mxu1 %vm2253_vm0, %v4060_v14  ;;  %2838 = vmatprep.subr.bf16.mxu0 %v4063_v16  ;;  %v3067_v14 = vunpack.c.0.s8 %v3066_v11 }
 0x294   :  { %v463_v16 = vrot.slane %v4350_v43, %v462_v12 }
 0x29a   :  { %3495 = vmatpush3.bf16.xpose.msra.mxu1 %v2318_v21  ;;  %2839 = vmatpush1.bf16.xpose.msra.mxu0 %v4061_v19 }
 0x29b   :  { %3594 = vmatprep.subr.msk.bf16.mxu1 %vm2253_vm0, %v4065_v22  ;;  %2840 = vmatprep.subr.bf16.mxu0 %v4068_v28  ;;  %v3070_v22 = vsub.s32 %v3067_v14, %v4266_v25 }
 0x2a2   :  { %3497 = vmatpush3.bf16.xpose.msra.mxu1 %v2321_v29  ;;  %2841 = vmatpush1.bf16.xpose.msra.mxu0 %v4066_v31  ;;  %v3071_v29 = vrot.slane %v3063_v23, %v3070_v22 }
 0x2a3   :  { %3595 = vmatprep.subr.msk.bf16.mxu1 %vm2253_vm0, %v4070_v32  ;;  %2842 = vmatprep.subr.bf16.mxu0 %v4073_v33 }
 0x2aa   :  { %3499 = vmatpush3.bf16.xpose.msra.mxu1 %v2324_v36  ;;  %2843 = vmatpush1.bf16.xpose.msra.mxu0 %v4071_v35  ;;  %v475_v35 = vrot.slane %v4350_v43, %v474_v34 }
 0x2ab   :  { %3596 = vmatprep.subr.msk.bf16.mxu1 %vm2253_vm0, %v4075_v38  ;;  %2844 = vmatprep.subr.bf16.mxu0 %v4078_v39 }
 0x2b2   :  { %3501 = vmatpush3.bf16.xpose.msra.mxu1 %v2327_v44  ;;  %2845 = vmatpush1.bf16.xpose.msra.mxu0 %v4076_v42 }
 0x2b3   :  { %3597 = vmatprep.subr.msk.bf16.mxu0 %vm2253_vm0, %v4080_v45  ;;  %2896 = vmatprep.subr.bf16.mxu1 %v4083_v46  ;;  %v466_v45 = vsub.s32 4, %v4266_v25  ;;  %v470_v46 = vsub.s32 5, %v4266_v25 }
 0x2b5   :  { %v467_v60 = vrot.slane %v4350_v43, %v466_v45  ;;  %v471_v2 = vrot.slane %v4350_v43, %v470_v46 }
 0x2b9   :  { %3503 = vmatmul.mubr.msk.bf16.vlgmr.msra.gmra.mrb[8].mxu1 %vm2253_vm0, %v4306_v24  ;;  %2847 = vmatmul.mubr.bf16.vlgmr.msra.gmra.mrb[4].mxu0 %v4297_v17 }
 0x2ba   :  { %3505 = vmatpush3.bf16.xpose.msra.mxu0 %v2354_v49  ;;  %2897 = vmatpush1.bf16.xpose.msra.mxu1 %v4081_v48 }
 0x2bb   :  { %2928 = vmatprep.mubr.bf16.mxu1 %v4280_v37  ;;  %3598 = vmatprep.subr.msk.bf16.mxu0 %vm2253_vm0, %v4085_v50  ;;  %v2360_v37 = vsel %vm2253_vm0, %v4091_v57, 0 }
 0x2bc   :  { %2936 = vmatprep.subr.bf16.mxu1 %v4089_v51  ;;  %3520 = vmatprep.mubr.msk.bf16.mxu0 %vm2253_vm0, %v4306_v24 }
 0x2c1   :  { %2929 = vmatmul.mubr.bf16.vlgmr.msra.gmra.mrb[12].mxu1 %v4293_v15  ;;  %v2363_v15 = vsel %vm2253_vm0, %v4096_v61, 0 }
 0x2c2   :  { %3507 = vmatpush3.bf16.xpose.msra.mxu0 %v2357_v54  ;;  %2937 = vmatpush1.bf16.xpose.msra.mxu1 %v4087_v53 }
 0x2c3   :  { %3599 = vmatprep.subr.msk.bf16.mxu0 %vm2253_vm0, %v4090_v55  ;;  %2968 = vmatprep.mubr.bf16.mxu1 %v4285_v40  ;;  %v4098_v40 = vld [vmem:[#allocation5 + $0x7f8] ss:$28 sps:$4 sm:$0xff]  }
 0x2c4   :  { %2976 = vmatprep.subr.bf16.mxu1 %v4095_v56  ;;  %v2366_v3 = vsel %vm2253_vm0, %v4098_v40, 0 }
 0x2ca   :  { %3509 = vmatpush3.bf16.xpose.msra.mxu0 %v2360_v37 }
 0x2cb   :  { %3600 = vmatprep.subr.msk.bf16.mxu0 %vm2253_vm0, %v4092_v58 }
 0x2cd   :  { %2969 = vmatmul.mubr.bf16.vlgmr.msra.gmra.mrb[12].mxu1 %v4301_v20  ;;  %v4101_v20 = vld [vmem:[#allocation5 + $0x830] ss:$28 sps:$4 sm:$0xff]  }
 0x2ce   :  { %2977 = vmatpush1.bf16.xpose.msra.mxu1 %v4093_v59  ;;  %3008 = vmatprep.mubr.bf16.mxu1 %v4309_v26  ;;  %v2369_v26 = vsel %vm2253_vm0, %v4101_v20, 0 }
 0x2cf   :  { %3524 = vmatprep.subr.bf16.mxu1 %v4206_v63 }
 0x2d2   :  { %3511 = vmatpush3.bf16.xpose.msra.mxu0 %v2363_v15 }
 0x2d3   :  { %3601 = vmatprep.subr.msk.bf16.mxu0 %vm2253_vm0, %v4097_v62 }
 0x2d9   :  { %3009 = vmatmul.mubr.bf16.vlgmr.msra.gmra.mrb[12].mxu1 %v4297_v17  ;;  %v4104_v17 = vld [vmem:[#allocation5 + $0xa60] ss:$28 sps:$4 sm:$0xff]  }
 0x2da   :  { %3513 = vmatpush3.bf16.xpose.msra.mxu0 %v2366_v3  ;;  %3525 = vmatpush3.bf16.xpose.msra.mxu1 %v2402_v4 }
 0x2db   :  { %3602 = vmatprep.subr.msk.bf16.mxu0 %vm2253_vm0, %v4100_v5  ;;  %3526 = vmatprep.mubr.msk.bf16.mxu1 %vm4207_vm1, %v4206_v63 }
 0x2e2   :  { %3515 = vmatpush3.bf16.xpose.msra.mxu0 %v2369_v26 }
 0x2e3   :  { %3603 = vmatprep.subr.msk.bf16.mxu0 %vm2253_vm0, %v4102_v0 }
 0x2e5   :  { %3527 = vmatmul.mubr.msk.bf16.vlgmr.msra.gmra.mrb[12].mxu1 %vm2253_vm0, %v4306_v24 }
 0x2ea   :  { %3517 = vmatpush3.bf16.xpose.msra.mxu0 %v2372_v7 }
 0x2eb   :  { %3604 = vmatprep.subr.msk.bf16.mxu0 %vm2253_vm0, %v4104_v17 }
 0x2f2   :  { %3519 = vmatpush3.bf16.xpose.msra.mxu0 %v2375_v8 }
 0x2f9   :  { %3521 = vmatmul.mubr.msk.bf16.vlgmr.msra.gmra.mrb[4].mxu0 %vm2253_vm0, %v4306_v24 }
 0x38c   :  { %v2725_v18 = vpop.f32.mrb[8].mxu1 }
 0x38d   :  { %v3536_v19 = vadd.f32 %v2725_v18, %v459_v13  ;;  %v2727_v21 = vpop.f32.mrb[9].mxu1 }
 0x38e   :  { %v3537_v28 = vadd.f32 %v2727_v21, %v463_v16  ;;  %v2729_v30 = vpop.f32.mrb[10].mxu1 }
 0x38f   :  { %v2730_v31 = vpop.f32.mrb[11].mxu1 }
 0x390   :  { %v3064_v24 = vcombine.low %v3536_v19, %v3537_v28 }
 0x392   :  { %v3078_v32 = vrot.slane %v3064_v24, %v3070_v22 }
 0x394   :  { %v3079_v33 = vcombine.low %v3071_v29, %v3078_v32 }
 0x396   :  { %3098 = vst [vmem:[#allocation8] sm:$0xff] %v3079_v33 }
 0x3b8   :  { %v3050_v36 = vpop.f32.mrb[12].mxu1 }
 0x3b9   :  { %v3540_v38 = vadd.f32 %v3050_v36, %v475_v35  ;;  %v3528_v39 = vpop.f32.mrb[13].mxu1 }
 0x3ba   :  { %v3053_v41 = vpop.f32.mrb[14].mxu1 }
 0x3bb   :  { %v3094_v42 = vrot.slane %v3540_v38, %v3070_v22  ;;  %v3529_v44 = vpop.f32.mrb[15].mxu1 }
 0x3cc   :  { %v2889_v23 = vpop.f32.mrb[4].mxu0 }
 0x3cd   :  { %v3538_v47 = vadd.f32 %v2889_v23, %v467_v60  ;;  %v2891_v48 = vpop.f32.mrb[5].mxu0 }
 0x3ce   :  { %v3539_v49 = vadd.f32 %v2891_v48, %v471_v2  ;;  %v2893_v50 = vpop.f32.mrb[6].mxu0 }
 0x3cf   :  { %v2894_v51 = vpop.f32.mrb[7].mxu0 }
 0x3d0   :  { %v3080_v52 = vcombine.low %v3538_v47, %v3539_v49 }
 0x3d2   :  { %v3087_v53 = vrot.slane %v3080_v52, %v3070_v22 }
 0x3d4   :  { %v3095_v25 = vcombine.low %v3087_v53, %v3094_v42 }
 0x3d6   :  { %3104 = vst.msk [vmem:[#allocation8 + $0x8] sm:$0x3f] %vm3103_vm6, %v3095_v25 }
 0x3d7   :  { %4183 = shalt.err (!%p4180_p0)
}
 0x3d8   :  { %s4184_s27 = scalar_lea.hbm %s4447_s3, 224 }
 0x3d9   :  { %p4185_p1 = scmp.ne.s32.totalorder %s4447_s3, %s4184_s27  ;;  %p4188_p2 = scmp.lt.u32.totalorder %s4184_s27, %s4447_s3 }
 0x3db   :  { %p4190_p3 = pnand %p4188_p2, %p4185_p1 }
 0x3dd   :  { %4193 = shalt.err (!%p4190_p3)
}
 0x3de   :  { %3114 = dma.vmem_to_hbm [thread:$0]  %s3112_s23, 224, %s4447_s3, [#allocation4]  }
 0x3df   :  { %4198 = dma.done.wait [#allocation4], 224  }
 0x3e0   :  { %4199 = vsyncadd [#allocation4], 4294967072 }
 0x3e1   :  { %3118 = vsyncpa [#allocation3], 1 }
 0x3e2   :  { %3119 = vsyncpa [#allocation6], 1 }
 0x3e3   :  { %3120 = vsyncpa [#allocation4], 1 }

</bundles_post_ra>
